<compile_context>
chip_gen: v6e
topology: v6e:2x2x1
jax: 0.10.0
libtpu: 0.0.40
codegen_flags: <defaults>
</compile_context>

<pallas_src>
import jax
import jax.numpy as jnp
from jax import lax
from jax.experimental import pallas as pl
from jax.experimental.pallas import tpu as pltpu

EMBED_DIM = 128
NUM_CLASS = 18
NUM_CLASS_PAD = 128          # lane-dense output width (sliced back to 18)
VOCAB = 100                  # stand-in for len(data_preprocess.tokens)
SUBLANE = 8                  # f32 sublane count


def rnn_classifier_kernel(xproj_ref,      # (T, Bt, D)  pre-projected layer-0 inputs
                          whh0_ref,       # (D, D)      W_hh0^T
                          wih1_ref,       # (D, D)      W_ih1^T
                          whh1_ref,       # (D, D)      W_hh1^T
                          b1_ref,         # (1, D)      b_ih1 + b_hh1
                          wlin_ref,       # (D, NUM_CLASS_PAD)  W_lin^T (padded)
                          blin_ref,       # (1, NUM_CLASS_PAD)  b_lin   (padded)
                          out_ref):       # (Bt, NUM_CLASS_PAD)
    T, Bt, D = xproj_ref.shape

    # Hoist the (1, D) -> (Bt, D) bias broadcast out of the recurrence (JAX does
    # not CSE broadcast_in_dim inside the unrolled body).
    b1b = jnp.broadcast_to(b1_ref[...], (Bt, D))
    h0 = jnp.zeros((Bt, D), jnp.float32)

    def step(t, carry):
        h1, h2 = carry
        # layer 0: only the recurrent matmul remains on the serial path
        # (x_t @ W_ih0 + b0 is the pre-gathered xproj_ref[t]).
        h1n = jnp.tanh(xproj_ref[t] +
                       jnp.dot(h1, whh0_ref[...],
                               preferred_element_type=jnp.float32))
        # layer 1: two K=128 dots (no per-step concatenate / lane relayout).
        h2n = jnp.tanh(jnp.dot(h1n, wih1_ref[...],
                               preferred_element_type=jnp.float32) +
                       jnp.dot(h2, whh1_ref[...],
                               preferred_element_type=jnp.float32) +
                       b1b)
        return (h1n, h2n)

    # Hidden state carried in vregs.  Full unroll for small tiles; cap unroll
    # for large tiles so the two (Bt, D) f32 carries + matmul temps don't spill.
    unroll = True if Bt <= 32 else 2
    _, h2 = lax.fori_loop(0, T, step, (h0, h0), unroll=unroll)

    # TODO(synk): nn.Dropout treated as eval-mode identity (no random masking).
    h_last = jnp.maximum(h2, 0.0)                         # relu_(out[:, -1, :])
    logits = (jnp.dot(h_last, wlin_ref[...], preferred_element_type=jnp.float32)
              + blin_ref[...])
    out_ref[...] = logits.astype(out_ref.dtype)


def prepack_params(params):
    """One-time prep: called once, NOT on the per-call path."""
    # Layer-0 input projection folded into the embedding table (+ b0).
    proj_table = (params["embedding"] @ params["w_ih0_T"] + params["b0"])  # (V, D)
    # Pad the classifier head to a lane-dense 128-wide output.
    wlin_p = jnp.pad(params["w_lin_T"], ((0, 0), (0, NUM_CLASS_PAD - NUM_CLASS)))
    blin_p = jnp.pad(params["b_lin"], ((0, 0), (0, NUM_CLASS_PAD - NUM_CLASS)))
    return dict(proj_table=proj_table,
                w_hh0_T=params["w_hh0_T"],
                w_ih1_T=params["w_ih1_T"],
                w_hh1_T=params["w_hh1_T"],
                b1=params["b1"],
                w_lin_pad=wlin_p,
                b_lin_pad=blin_p)


def _choose_batch_tile(B):
    """Fill the MXU M dim (up to 128 rows) but keep >=2 tiles for v7x megacore
    when the batch is big enough; tiny batches use a single 8-row tile."""
    if B <= SUBLANE:
        return SUBLANE
    half = -(-B // 2)                                  # ceil(B / 2)
    return min(128, -(-half // SUBLANE) * SUBLANE)     # round up to sublane mult


def text_classification_forward(tokens, packed):
    B, T = tokens.shape
    D = EMBED_DIM
    b_tile = _choose_batch_tile(B)
    B_pad = pl.cdiv(B, b_tile) * b_tile

    # Layer-0 input projection for all timesteps = one gather of prepacked rows.
    # Gathering with tokens.T also folds the batch-first -> time-major transpose.
    xproj = packed["proj_table"][tokens.T]             # (T, B, D)
    if B_pad != B:
        xproj = jnp.pad(xproj, ((0, 0), (0, B_pad - B), (0, 0)))

    out = pl.pallas_call(
        rnn_classifier_kernel,
        out_shape=jax.ShapeDtypeStruct((B_pad, NUM_CLASS_PAD), jnp.float32),
        grid=(B_pad // b_tile,),
        in_specs=[
            pl.BlockSpec((T, b_tile, D), lambda i: (0, i, 0)),    # xproj (batch-tiled)
            pl.BlockSpec((D, D), lambda i: (0, 0)),               # W_hh0^T
            pl.BlockSpec((D, D), lambda i: (0, 0)),               # W_ih1^T
            pl.BlockSpec((D, D), lambda i: (0, 0)),               # W_hh1^T
            pl.BlockSpec((1, D), lambda i: (0, 0)),               # b1
            pl.BlockSpec((D, NUM_CLASS_PAD), lambda i: (0, 0)),   # W_lin^T (padded)
            pl.BlockSpec((1, NUM_CLASS_PAD), lambda i: (0, 0)),   # b_lin   (padded)
        ],
        out_specs=pl.BlockSpec((b_tile, NUM_CLASS_PAD), lambda i: (i, 0)),
        compiler_params=pltpu.CompilerParams(
            dimension_semantics=("parallel",)),
    )(xproj,
      packed["w_hh0_T"], packed["w_ih1_T"], packed["w_hh1_T"], packed["b1"],
      packed["w_lin_pad"], packed["b_lin_pad"])

    return out[:B, :NUM_CLASS]


def reference_forward(tokens, params):
    emb = params["embedding"][tokens]
    B, T, D = emb.shape
    h1 = jnp.zeros((B, D), jnp.float32)
    h2 = jnp.zeros((B, D), jnp.float32)
    for t in range(T):
        h1 = jnp.tanh(emb[:, t] @ params["w_ih0_T"] + h1 @ params["w_hh0_T"]
                      + params["b0"])
        h2 = jnp.tanh(h1 @ params["w_ih1_T"] + h2 @ params["w_hh1_T"]
                      + params["b1"])
    h = jnp.maximum(h2, 0.0)
    return h @ params["w_lin_T"] + params["b_lin"]


def init_params(key):
    ks = jax.random.split(key, 12)
    k_emb = 1.0 / jnp.sqrt(EMBED_DIM)

    def u(k, shape, bound):
        return jax.random.uniform(k, shape, jnp.float32, -bound, bound)

    embedding = jax.random.normal(ks[0], (VOCAB, EMBED_DIM), jnp.float32)
    embedding = embedding.at[0].set(0.0)                  # padding_idx=0

    # PyTorch nn.RNN stores weight_ih_l{k}, weight_hh_l{k} as (hidden, input);
    # we pass their transposes.  Biases b_ih + b_hh folded into one vector.
    w_ih0_T = u(ks[1], (EMBED_DIM, EMBED_DIM), k_emb)
    w_hh0_T = u(ks[2], (EMBED_DIM, EMBED_DIM), k_emb)
    b0 = (u(ks[3], (1, EMBED_DIM), k_emb) + u(ks[4], (1, EMBED_DIM), k_emb))
    w_ih1_T = u(ks[5], (EMBED_DIM, EMBED_DIM), k_emb)
    w_hh1_T = u(ks[6], (EMBED_DIM, EMBED_DIM), k_emb)
    b1 = (u(ks[7], (1, EMBED_DIM), k_emb) + u(ks[8], (1, EMBED_DIM), k_emb))

    # nn.Linear(128, 18): weight (18, 128) -> pass transpose (128, 18).
    w_lin_T = u(ks[9], (EMBED_DIM, NUM_CLASS), k_emb)
    b_lin = u(ks[10], (1, NUM_CLASS), k_emb)

    return dict(embedding=embedding,
                w_ih0_T=w_ih0_T, w_hh0_T=w_hh0_T, b0=b0,
                w_ih1_T=w_ih1_T, w_hh1_T=w_hh1_T, b1=b1,
                w_lin_T=w_lin_T, b_lin=b_lin)


if __name__ == "__main__":
    key = jax.random.PRNGKey(0)
    k_params, k_tok = jax.random.split(key)
    params = init_params(k_params)
    packed = prepack_params(params)       # one-time prepack, off the per-call path

    B, T = 2, 8
    tokens = jax.random.randint(k_tok, (B, T), 0, VOCAB, dtype=jnp.int32)
    tokens = tokens.at[0, 0].set(0)       # exercise padding_idx

    fwd = jax.jit(text_classification_forward)
    out = jax.block_until_ready(fwd(tokens, packed))

    ref = reference_forward(tokens, params)
    assert out.shape == (B, NUM_CLASS)
    assert jnp.allclose(out, ref, atol=1e-4, rtol=1e-4)

    print("KERNEL_OK")
</pallas_src>

<mosaic_0001>
module attributes {stable_mosaic.version = 11 : i64} {
  func.func @rnn_classifier_kernel(%arg0: i32, %arg1: memref<8x8x128xf32, #tpu.memory_space<vmem>>, %arg2: memref<128x128xf32, #tpu.memory_space<vmem>>, %arg3: memref<128x128xf32, #tpu.memory_space<vmem>>, %arg4: memref<128x128xf32, #tpu.memory_space<vmem>>, %arg5: memref<1x128xf32, #tpu.memory_space<vmem>>, %arg6: memref<128x128xf32, #tpu.memory_space<vmem>>, %arg7: memref<1x128xf32, #tpu.memory_space<vmem>>, %arg8: memref<8x128xf32, #tpu.memory_space<vmem>>) attributes {dimension_semantics = [#tpu.dimension_semantics<parallel>], iteration_bounds = array<i64: 1>, scalar_prefetch = 0 : i64, scratch_operands = 0 : i64, tpu.core_type = #tpu.core_type<tc>, window_params = [{transform_indices = @transform_0, window_bounds = array<i64: 8, 8, 128>}, {pipeline_mode = #tpu.pipeline_mode<synchronous>, transform_indices = @transform_1, window_bounds = array<i64: 128, 128>}, {pipeline_mode = #tpu.pipeline_mode<synchronous>, transform_indices = @transform_2, window_bounds = array<i64: 128, 128>}, {pipeline_mode = #tpu.pipeline_mode<synchronous>, transform_indices = @transform_3, window_bounds = array<i64: 128, 128>}, {pipeline_mode = #tpu.pipeline_mode<synchronous>, transform_indices = @transform_4, window_bounds = array<i64: 1, 128>}, {pipeline_mode = #tpu.pipeline_mode<synchronous>, transform_indices = @transform_5, window_bounds = array<i64: 128, 128>}, {pipeline_mode = #tpu.pipeline_mode<synchronous>, transform_indices = @transform_6, window_bounds = array<i64: 1, 128>}, {transform_indices = @transform_7, window_bounds = array<i64: 8, 128>}]} {
    %c0 = arith.constant 0 : index
    %c0_0 = arith.constant 0 : index
    %0 = vector.load %arg5[%c0, %c0_0] : memref<1x128xf32, #tpu.memory_space<vmem>>, vector<1x128xf32>
    %1 = vector.shape_cast %0 : vector<1x128xf32> to vector<1x128xf32>
    %2 = vector.broadcast %1 : vector<1x128xf32> to vector<8x128xf32>
    %cst = arith.constant 0.000000e+00 : f32
    %3 = vector.broadcast %cst : f32 to vector<8x128xf32>
    %c0_i32 = arith.constant 0 : i32
    %4 = arith.index_cast %c0_i32 : i32 to index
    %c0_1 = arith.constant 0 : index
    %c0_2 = arith.constant 0 : index
    %5 = vector.load %arg1[%4, %c0_1, %c0_2] : memref<8x8x128xf32, #tpu.memory_space<vmem>>, vector<1x8x128xf32>
    %6 = vector.shape_cast %5 : vector<1x8x128xf32> to vector<8x128xf32>
    %c0_3 = arith.constant 0 : index
    %c0_4 = arith.constant 0 : index
    %7 = vector.load %arg2[%c0_3, %c0_4] : memref<128x128xf32, #tpu.memory_space<vmem>>, vector<128x128xf32>
    %cst_5 = arith.constant dense<0.000000e+00> : vector<8x128xf32>
    %8 = tpu.matmul %3, %7, %cst_5 {dimension_numbers = #tpu.dot_dimension_numbers<[1], [0], [0], [1], [0, 0, 1, 1], [], []>} : vector<8x128xf32>, vector<128x128xf32>, vector<8x128xf32> -> vector<8x128xf32>
    %9 = arith.addf %6, %8 : vector<8x128xf32>
    %10 = math.tanh %9 : vector<8x128xf32>
    %c0_6 = arith.constant 0 : index
    %c0_7 = arith.constant 0 : index
    %11 = vector.load %arg3[%c0_6, %c0_7] : memref<128x128xf32, #tpu.memory_space<vmem>>, vector<128x128xf32>
    %cst_8 = arith.constant dense<0.000000e+00> : vector<8x128xf32>
    %12 = tpu.matmul %10, %11, %cst_8 {dimension_numbers = #tpu.dot_dimension_numbers<[1], [0], [0], [1], [0, 0, 1, 1], [], []>} : vector<8x128xf32>, vector<128x128xf32>, vector<8x128xf32> -> vector<8x128xf32>
    %c0_9 = arith.constant 0 : index
    %c0_10 = arith.constant 0 : index
    %13 = vector.load %arg4[%c0_9, %c0_10] : memref<128x128xf32, #tpu.memory_space<vmem>>, vector<128x128xf32>
    %cst_11 = arith.constant dense<0.000000e+00> : vector<8x128xf32>
    %14 = tpu.matmul %3, %13, %cst_11 {dimension_numbers = #tpu.dot_dimension_numbers<[1], [0], [0], [1], [0, 0, 1, 1], [], []>} : vector<8x128xf32>, vector<128x128xf32>, vector<8x128xf32> -> vector<8x128xf32>
    %15 = arith.addf %12, %14 : vector<8x128xf32>
    %16 = arith.addf %15, %2 : vector<8x128xf32>
    %17 = math.tanh %16 : vector<8x128xf32>
    %c1_i32 = arith.constant 1 : i32
    %18 = arith.index_cast %c1_i32 : i32 to index
    %c0_12 = arith.constant 0 : index
    %c0_13 = arith.constant 0 : index
    %19 = vector.load %arg1[%18, %c0_12, %c0_13] : memref<8x8x128xf32, #tpu.memory_space<vmem>>, vector<1x8x128xf32>
    %20 = vector.shape_cast %19 : vector<1x8x128xf32> to vector<8x128xf32>
    %c0_14 = arith.constant 0 : index
    %c0_15 = arith.constant 0 : index
    %21 = vector.load %arg2[%c0_14, %c0_15] : memref<128x128xf32, #tpu.memory_space<vmem>>, vector<128x128xf32>
    %cst_16 = arith.constant dense<0.000000e+00> : vector<8x128xf32>
    %22 = tpu.matmul %10, %21, %cst_16 {dimension_numbers = #tpu.dot_dimension_numbers<[1], [0], [0], [1], [0, 0, 1, 1], [], []>} : vector<8x128xf32>, vector<128x128xf32>, vector<8x128xf32> -> vector<8x128xf32>
    %23 = arith.addf %20, %22 : vector<8x128xf32>
    %24 = math.tanh %23 : vector<8x128xf32>
    %c0_17 = arith.constant 0 : index
    %c0_18 = arith.constant 0 : index
    %25 = vector.load %arg3[%c0_17, %c0_18] : memref<128x128xf32, #tpu.memory_space<vmem>>, vector<128x128xf32>
    %cst_19 = arith.constant dense<0.000000e+00> : vector<8x128xf32>
    %26 = tpu.matmul %24, %25, %cst_19 {dimension_numbers = #tpu.dot_dimension_numbers<[1], [0], [0], [1], [0, 0, 1, 1], [], []>} : vector<8x128xf32>, vector<128x128xf32>, vector<8x128xf32> -> vector<8x128xf32>
    %c0_20 = arith.constant 0 : index
    %c0_21 = arith.constant 0 : index
    %27 = vector.load %arg4[%c0_20, %c0_21] : memref<128x128xf32, #tpu.memory_space<vmem>>, vector<128x128xf32>
    %cst_22 = arith.constant dense<0.000000e+00> : vector<8x128xf32>
    %28 = tpu.matmul %17, %27, %cst_22 {dimension_numbers = #tpu.dot_dimension_numbers<[1], [0], [0], [1], [0, 0, 1, 1], [], []>} : vector<8x128xf32>, vector<128x128xf32>, vector<8x128xf32> -> vector<8x128xf32>
    %29 = arith.addf %26, %28 : vector<8x128xf32>
    %30 = arith.addf %29, %2 : vector<8x128xf32>
    %31 = math.tanh %30 : vector<8x128xf32>
    %c2_i32 = arith.constant 2 : i32
    %32 = arith.index_cast %c2_i32 : i32 to index
    %c0_23 = arith.constant 0 : index
    %c0_24 = arith.constant 0 : index
    %33 = vector.load %arg1[%32, %c0_23, %c0_24] : memref<8x8x128xf32, #tpu.memory_space<vmem>>, vector<1x8x128xf32>
    %34 = vector.shape_cast %33 : vector<1x8x128xf32> to vector<8x128xf32>
    %c0_25 = arith.constant 0 : index
    %c0_26 = arith.constant 0 : index
    %35 = vector.load %arg2[%c0_25, %c0_26] : memref<128x128xf32, #tpu.memory_space<vmem>>, vector<128x128xf32>
    %cst_27 = arith.constant dense<0.000000e+00> : vector<8x128xf32>
    %36 = tpu.matmul %24, %35, %cst_27 {dimension_numbers = #tpu.dot_dimension_numbers<[1], [0], [0], [1], [0, 0, 1, 1], [], []>} : vector<8x128xf32>, vector<128x128xf32>, vector<8x128xf32> -> vector<8x128xf32>
    %37 = arith.addf %34, %36 : vector<8x128xf32>
    %38 = math.tanh %37 : vector<8x128xf32>
    %c0_28 = arith.constant 0 : index
    %c0_29 = arith.constant 0 : index
    %39 = vector.load %arg3[%c0_28, %c0_29] : memref<128x128xf32, #tpu.memory_space<vmem>>, vector<128x128xf32>
    %cst_30 = arith.constant dense<0.000000e+00> : vector<8x128xf32>
    %40 = tpu.matmul %38, %39, %cst_30 {dimension_numbers = #tpu.dot_dimension_numbers<[1], [0], [0], [1], [0, 0, 1, 1], [], []>} : vector<8x128xf32>, vector<128x128xf32>, vector<8x128xf32> -> vector<8x128xf32>
    %c0_31 = arith.constant 0 : index
    %c0_32 = arith.constant 0 : index
    %41 = vector.load %arg4[%c0_31, %c0_32] : memref<128x128xf32, #tpu.memory_space<vmem>>, vector<128x128xf32>
    %cst_33 = arith.constant dense<0.000000e+00> : vector<8x128xf32>
    %42 = tpu.matmul %31, %41, %cst_33 {dimension_numbers = #tpu.dot_dimension_numbers<[1], [0], [0], [1], [0, 0, 1, 1], [], []>} : vector<8x128xf32>, vector<128x128xf32>, vector<8x128xf32> -> vector<8x128xf32>
    %43 = arith.addf %40, %42 : vector<8x128xf32>
    %44 = arith.addf %43, %2 : vector<8x128xf32>
    %45 = math.tanh %44 : vector<8x128xf32>
    %c3_i32 = arith.constant 3 : i32
    %46 = arith.index_cast %c3_i32 : i32 to index
    %c0_34 = arith.constant 0 : index
    %c0_35 = arith.constant 0 : index
    %47 = vector.load %arg1[%46, %c0_34, %c0_35] : memref<8x8x128xf32, #tpu.memory_space<vmem>>, vector<1x8x128xf32>
    %48 = vector.shape_cast %47 : vector<1x8x128xf32> to vector<8x128xf32>
    %c0_36 = arith.constant 0 : index
    %c0_37 = arith.constant 0 : index
    %49 = vector.load %arg2[%c0_36, %c0_37] : memref<128x128xf32, #tpu.memory_space<vmem>>, vector<128x128xf32>
    %cst_38 = arith.constant dense<0.000000e+00> : vector<8x128xf32>
    %50 = tpu.matmul %38, %49, %cst_38 {dimension_numbers = #tpu.dot_dimension_numbers<[1], [0], [0], [1], [0, 0, 1, 1], [], []>} : vector<8x128xf32>, vector<128x128xf32>, vector<8x128xf32> -> vector<8x128xf32>
    %51 = arith.addf %48, %50 : vector<8x128xf32>
    %52 = math.tanh %51 : vector<8x128xf32>
    %c0_39 = arith.constant 0 : index
    %c0_40 = arith.constant 0 : index
    %53 = vector.load %arg3[%c0_39, %c0_40] : memref<128x128xf32, #tpu.memory_space<vmem>>, vector<128x128xf32>
    %cst_41 = arith.constant dense<0.000000e+00> : vector<8x128xf32>
    %54 = tpu.matmul %52, %53, %cst_41 {dimension_numbers = #tpu.dot_dimension_numbers<[1], [0], [0], [1], [0, 0, 1, 1], [], []>} : vector<8x128xf32>, vector<128x128xf32>, vector<8x128xf32> -> vector<8x128xf32>
    %c0_42 = arith.constant 0 : index
    %c0_43 = arith.constant 0 : index
    %55 = vector.load %arg4[%c0_42, %c0_43] : memref<128x128xf32, #tpu.memory_space<vmem>>, vector<128x128xf32>
    %cst_44 = arith.constant dense<0.000000e+00> : vector<8x128xf32>
    %56 = tpu.matmul %45, %55, %cst_44 {dimension_numbers = #tpu.dot_dimension_numbers<[1], [0], [0], [1], [0, 0, 1, 1], [], []>} : vector<8x128xf32>, vector<128x128xf32>, vector<8x128xf32> -> vector<8x128xf32>
    %57 = arith.addf %54, %56 : vector<8x128xf32>
    %58 = arith.addf %57, %2 : vector<8x128xf32>
    %59 = math.tanh %58 : vector<8x128xf32>
    %c4_i32 = arith.constant 4 : i32
    %60 = arith.index_cast %c4_i32 : i32 to index
    %c0_45 = arith.constant 0 : index
    %c0_46 = arith.constant 0 : index
    %61 = vector.load %arg1[%60, %c0_45, %c0_46] : memref<8x8x128xf32, #tpu.memory_space<vmem>>, vector<1x8x128xf32>
    %62 = vector.shape_cast %61 : vector<1x8x128xf32> to vector<8x128xf32>
    %c0_47 = arith.constant 0 : index
    %c0_48 = arith.constant 0 : index
    %63 = vector.load %arg2[%c0_47, %c0_48] : memref<128x128xf32, #tpu.memory_space<vmem>>, vector<128x128xf32>
    %cst_49 = arith.constant dense<0.000000e+00> : vector<8x128xf32>
    %64 = tpu.matmul %52, %63, %cst_49 {dimension_numbers = #tpu.dot_dimension_numbers<[1], [0], [0], [1], [0, 0, 1, 1], [], []>} : vector<8x128xf32>, vector<128x128xf32>, vector<8x128xf32> -> vector<8x128xf32>
    %65 = arith.addf %62, %64 : vector<8x128xf32>
    %66 = math.tanh %65 : vector<8x128xf32>
    %c0_50 = arith.constant 0 : index
    %c0_51 = arith.constant 0 : index
    %67 = vector.load %arg3[%c0_50, %c0_51] : memref<128x128xf32, #tpu.memory_space<vmem>>, vector<128x128xf32>
    %cst_52 = arith.constant dense<0.000000e+00> : vector<8x128xf32>
    %68 = tpu.matmul %66, %67, %cst_52 {dimension_numbers = #tpu.dot_dimension_numbers<[1], [0], [0], [1], [0, 0, 1, 1], [], []>} : vector<8x128xf32>, vector<128x128xf32>, vector<8x128xf32> -> vector<8x128xf32>
    %c0_53 = arith.constant 0 : index
    %c0_54 = arith.constant 0 : index
    %69 = vector.load %arg4[%c0_53, %c0_54] : memref<128x128xf32, #tpu.memory_space<vmem>>, vector<128x128xf32>
    %cst_55 = arith.constant dense<0.000000e+00> : vector<8x128xf32>
    %70 = tpu.matmul %59, %69, %cst_55 {dimension_numbers = #tpu.dot_dimension_numbers<[1], [0], [0], [1], [0, 0, 1, 1], [], []>} : vector<8x128xf32>, vector<128x128xf32>, vector<8x128xf32> -> vector<8x128xf32>
    %71 = arith.addf %68, %70 : vector<8x128xf32>
    %72 = arith.addf %71, %2 : vector<8x128xf32>
    %73 = math.tanh %72 : vector<8x128xf32>
    %c5_i32 = arith.constant 5 : i32
    %74 = arith.index_cast %c5_i32 : i32 to index
    %c0_56 = arith.constant 0 : index
    %c0_57 = arith.constant 0 : index
    %75 = vector.load %arg1[%74, %c0_56, %c0_57] : memref<8x8x128xf32, #tpu.memory_space<vmem>>, vector<1x8x128xf32>
    %76 = vector.shape_cast %75 : vector<1x8x128xf32> to vector<8x128xf32>
    %c0_58 = arith.constant 0 : index
    %c0_59 = arith.constant 0 : index
    %77 = vector.load %arg2[%c0_58, %c0_59] : memref<128x128xf32, #tpu.memory_space<vmem>>, vector<128x128xf32>
    %cst_60 = arith.constant dense<0.000000e+00> : vector<8x128xf32>
    %78 = tpu.matmul %66, %77, %cst_60 {dimension_numbers = #tpu.dot_dimension_numbers<[1], [0], [0], [1], [0, 0, 1, 1], [], []>} : vector<8x128xf32>, vector<128x128xf32>, vector<8x128xf32> -> vector<8x128xf32>
    %79 = arith.addf %76, %78 : vector<8x128xf32>
    %80 = math.tanh %79 : vector<8x128xf32>
    %c0_61 = arith.constant 0 : index
    %c0_62 = arith.constant 0 : index
    %81 = vector.load %arg3[%c0_61, %c0_62] : memref<128x128xf32, #tpu.memory_space<vmem>>, vector<128x128xf32>
    %cst_63 = arith.constant dense<0.000000e+00> : vector<8x128xf32>
    %82 = tpu.matmul %80, %81, %cst_63 {dimension_numbers = #tpu.dot_dimension_numbers<[1], [0], [0], [1], [0, 0, 1, 1], [], []>} : vector<8x128xf32>, vector<128x128xf32>, vector<8x128xf32> -> vector<8x128xf32>
    %c0_64 = arith.constant 0 : index
    %c0_65 = arith.constant 0 : index
    %83 = vector.load %arg4[%c0_64, %c0_65] : memref<128x128xf32, #tpu.memory_space<vmem>>, vector<128x128xf32>
    %cst_66 = arith.constant dense<0.000000e+00> : vector<8x128xf32>
    %84 = tpu.matmul %73, %83, %cst_66 {dimension_numbers = #tpu.dot_dimension_numbers<[1], [0], [0], [1], [0, 0, 1, 1], [], []>} : vector<8x128xf32>, vector<128x128xf32>, vector<8x128xf32> -> vector<8x128xf32>
    %85 = arith.addf %82, %84 : vector<8x128xf32>
    %86 = arith.addf %85, %2 : vector<8x128xf32>
    %87 = math.tanh %86 : vector<8x128xf32>
    %c6_i32 = arith.constant 6 : i32
    %88 = arith.index_cast %c6_i32 : i32 to index
    %c0_67 = arith.constant 0 : index
    %c0_68 = arith.constant 0 : index
    %89 = vector.load %arg1[%88, %c0_67, %c0_68] : memref<8x8x128xf32, #tpu.memory_space<vmem>>, vector<1x8x128xf32>
    %90 = vector.shape_cast %89 : vector<1x8x128xf32> to vector<8x128xf32>
    %c0_69 = arith.constant 0 : index
    %c0_70 = arith.constant 0 : index
    %91 = vector.load %arg2[%c0_69, %c0_70] : memref<128x128xf32, #tpu.memory_space<vmem>>, vector<128x128xf32>
    %cst_71 = arith.constant dense<0.000000e+00> : vector<8x128xf32>
    %92 = tpu.matmul %80, %91, %cst_71 {dimension_numbers = #tpu.dot_dimension_numbers<[1], [0], [0], [1], [0, 0, 1, 1], [], []>} : vector<8x128xf32>, vector<128x128xf32>, vector<8x128xf32> -> vector<8x128xf32>
    %93 = arith.addf %90, %92 : vector<8x128xf32>
    %94 = math.tanh %93 : vector<8x128xf32>
    %c0_72 = arith.constant 0 : index
    %c0_73 = arith.constant 0 : index
    %95 = vector.load %arg3[%c0_72, %c0_73] : memref<128x128xf32, #tpu.memory_space<vmem>>, vector<128x128xf32>
    %cst_74 = arith.constant dense<0.000000e+00> : vector<8x128xf32>
    %96 = tpu.matmul %94, %95, %cst_74 {dimension_numbers = #tpu.dot_dimension_numbers<[1], [0], [0], [1], [0, 0, 1, 1], [], []>} : vector<8x128xf32>, vector<128x128xf32>, vector<8x128xf32> -> vector<8x128xf32>
    %c0_75 = arith.constant 0 : index
    %c0_76 = arith.constant 0 : index
    %97 = vector.load %arg4[%c0_75, %c0_76] : memref<128x128xf32, #tpu.memory_space<vmem>>, vector<128x128xf32>
    %cst_77 = arith.constant dense<0.000000e+00> : vector<8x128xf32>
    %98 = tpu.matmul %87, %97, %cst_77 {dimension_numbers = #tpu.dot_dimension_numbers<[1], [0], [0], [1], [0, 0, 1, 1], [], []>} : vector<8x128xf32>, vector<128x128xf32>, vector<8x128xf32> -> vector<8x128xf32>
    %99 = arith.addf %96, %98 : vector<8x128xf32>
    %100 = arith.addf %99, %2 : vector<8x128xf32>
    %101 = math.tanh %100 : vector<8x128xf32>
    %c7_i32 = arith.constant 7 : i32
    %102 = arith.index_cast %c7_i32 : i32 to index
    %c0_78 = arith.constant 0 : index
    %c0_79 = arith.constant 0 : index
    %103 = vector.load %arg1[%102, %c0_78, %c0_79] : memref<8x8x128xf32, #tpu.memory_space<vmem>>, vector<1x8x128xf32>
    %104 = vector.shape_cast %103 : vector<1x8x128xf32> to vector<8x128xf32>
    %c0_80 = arith.constant 0 : index
    %c0_81 = arith.constant 0 : index
    %105 = vector.load %arg2[%c0_80, %c0_81] : memref<128x128xf32, #tpu.memory_space<vmem>>, vector<128x128xf32>
    %cst_82 = arith.constant dense<0.000000e+00> : vector<8x128xf32>
    %106 = tpu.matmul %94, %105, %cst_82 {dimension_numbers = #tpu.dot_dimension_numbers<[1], [0], [0], [1], [0, 0, 1, 1], [], []>} : vector<8x128xf32>, vector<128x128xf32>, vector<8x128xf32> -> vector<8x128xf32>
    %107 = arith.addf %104, %106 : vector<8x128xf32>
    %108 = math.tanh %107 : vector<8x128xf32>
    %c0_83 = arith.constant 0 : index
    %c0_84 = arith.constant 0 : index
    %109 = vector.load %arg3[%c0_83, %c0_84] : memref<128x128xf32, #tpu.memory_space<vmem>>, vector<128x128xf32>
    %cst_85 = arith.constant dense<0.000000e+00> : vector<8x128xf32>
    %110 = tpu.matmul %108, %109, %cst_85 {dimension_numbers = #tpu.dot_dimension_numbers<[1], [0], [0], [1], [0, 0, 1, 1], [], []>} : vector<8x128xf32>, vector<128x128xf32>, vector<8x128xf32> -> vector<8x128xf32>
    %c0_86 = arith.constant 0 : index
    %c0_87 = arith.constant 0 : index
    %111 = vector.load %arg4[%c0_86, %c0_87] : memref<128x128xf32, #tpu.memory_space<vmem>>, vector<128x128xf32>
    %cst_88 = arith.constant dense<0.000000e+00> : vector<8x128xf32>
    %112 = tpu.matmul %101, %111, %cst_88 {dimension_numbers = #tpu.dot_dimension_numbers<[1], [0], [0], [1], [0, 0, 1, 1], [], []>} : vector<8x128xf32>, vector<128x128xf32>, vector<8x128xf32> -> vector<8x128xf32>
    %113 = arith.addf %110, %112 : vector<8x128xf32>
    %114 = arith.addf %113, %2 : vector<8x128xf32>
    %115 = math.tanh %114 : vector<8x128xf32>
    %c8_i32 = arith.constant 8 : i32
    %cst_89 = arith.constant 0.000000e+00 : f32
    %116 = vector.broadcast %cst_89 : f32 to vector<8x128xf32>
    %117 = arith.maximumf %115, %116 : vector<8x128xf32>
    %c0_90 = arith.constant 0 : index
    %c0_91 = arith.constant 0 : index
    %118 = vector.load %arg6[%c0_90, %c0_91] : memref<128x128xf32, #tpu.memory_space<vmem>>, vector<128x128xf32>
    %cst_92 = arith.constant dense<0.000000e+00> : vector<8x128xf32>
    %119 = tpu.matmul %117, %118, %cst_92 {dimension_numbers = #tpu.dot_dimension_numbers<[1], [0], [0], [1], [0, 0, 1, 1], [], []>} : vector<8x128xf32>, vector<128x128xf32>, vector<8x128xf32> -> vector<8x128xf32>
    %c0_93 = arith.constant 0 : index
    %c0_94 = arith.constant 0 : index
    %120 = vector.load %arg7[%c0_93, %c0_94] : memref<1x128xf32, #tpu.memory_space<vmem>>, vector<1x128xf32>
    %121 = vector.broadcast %120 : vector<1x128xf32> to vector<8x128xf32>
    %122 = arith.addf %119, %121 : vector<8x128xf32>
    %c0_95 = arith.constant 0 : index
    %c0_96 = arith.constant 0 : index
    %123 = vector.load %arg8[%c0_95, %c0_96] : memref<8x128xf32, #tpu.memory_space<vmem>>, vector<8x128xf32>
    tpu.vector_store %arg8[%c0_95, %c0_96], %122 {strides = array<i32>} : memref<8x128xf32, #tpu.memory_space<vmem>>, vector<8x128xf32>,
    return
  }
  func.func @transform_0(%arg0: i32) -> (i32, i32, i32) {
    %c0_i32 = arith.constant 0 : i32
    %c0_i32_0 = arith.constant 0 : i32
    %c0_i32_1 = arith.constant 0 : i32
    return %c0_i32, %arg0, %c0_i32_0 : i32, i32, i32
  }
  func.func @transform_1(%arg0: i32) -> (i32, i32) {
    %c0_i32 = arith.constant 0 : i32
    %c0_i32_0 = arith.constant 0 : i32
    %c0_i32_1 = arith.constant 0 : i32
    return %c0_i32, %c0_i32_0 : i32, i32
  }
  func.func @transform_2(%arg0: i32) -> (i32, i32) {
    %c0_i32 = arith.constant 0 : i32
    %c0_i32_0 = arith.constant 0 : i32
    %c0_i32_1 = arith.constant 0 : i32
    return %c0_i32, %c0_i32_0 : i32, i32
  }
  func.func @transform_3(%arg0: i32) -> (i32, i32) {
    %c0_i32 = arith.constant 0 : i32
    %c0_i32_0 = arith.constant 0 : i32
    %c0_i32_1 = arith.constant 0 : i32
    return %c0_i32, %c0_i32_0 : i32, i32
  }
  func.func @transform_4(%arg0: i32) -> (i32, i32) {
    %c0_i32 = arith.constant 0 : i32
    %c0_i32_0 = arith.constant 0 : i32
    %c0_i32_1 = arith.constant 0 : i32
    return %c0_i32, %c0_i32_0 : i32, i32
  }
  func.func @transform_5(%arg0: i32) -> (i32, i32) {
    %c0_i32 = arith.constant 0 : i32
    %c0_i32_0 = arith.constant 0 : i32
    %c0_i32_1 = arith.constant 0 : i32
    return %c0_i32, %c0_i32_0 : i32, i32
  }
  func.func @transform_6(%arg0: i32) -> (i32, i32) {
    %c0_i32 = arith.constant 0 : i32
    %c0_i32_0 = arith.constant 0 : i32
    %c0_i32_1 = arith.constant 0 : i32
    return %c0_i32, %c0_i32_0 : i32, i32
  }
  func.func @transform_7(%arg0: i32) -> (i32, i32) {
    %c0_i32 = arith.constant 0 : i32
    %c0_i32_0 = arith.constant 0 : i32
    return %arg0, %c0_i32 : i32, i32
  }
}

</mosaic_0001>

<bundles_post_ra>
// kernel: text_classification_forward.1
= control target key start
LH: loop header
LB: loop body
LE: loop exit
PB: predicated region body
PF: predicated region fallthrough
CT: control target
= control target key end

     0   :  { %12 = vsyncpa [#allocation3], 0  ;;  %s4712_s0 = inlined_call_operand.vmem [shape: f32[8,8,128], index: 0, kind: input, shape index: {}]   ;;  %s4713_s1 = inlined_call_operand.vmem [shape: f32[128,128], index: 1, kind: input, shape index: {}]   ;;  %s4714_s2 = inlined_call_operand.vmem [shape: f32[128,128], index: 2, kind: input, shape index: {}]   ;;  %s4715_s3 = inlined_call_operand.hbm [shape: f32[128,128], index: 3, kind: input, shape index: {}]   ;;  %s4716_s4 = inlined_call_operand.vmem [shape: f32[1,128], index: 4, kind: input, shape index: {}]   ;;  %s4717_s5 = inlined_call_operand.hbm [shape: f32[128,128], index: 5, kind: input, shape index: {}]   ;;  %s4718_s6 = inlined_call_operand.vmem [shape: f32[1,128], index: 6, kind: input, shape index: {}]   ;;  %s4719_s7 = inlined_call_operand.vmem [shape: f32[8,128], index: 7, kind: output, shape index: {}]  }
   0x1   :  { %13 = vsyncpa [#allocation5], 0  ;;  %s3377_s24 = smov [#allocation2]  }
   0x2   :  { %s25_s25 = sshll.u32 %s3377_s24, 4  ;;  %s26_s25 = int_to_ptr.vmem [resolvable:$true] %s25_s25 }
   0x3   :  { %s3341_s26 = scalar_lea.vmem %s26_s25, 2048  ;;  %p3346_p1 = scmp.lt.s32.totalorder %s26_s25, %s26_s25 }
   0x4   :  { %p3342_p0 = scmp.ne.s32.totalorder %s26_s25, %s3341_s26  ;;  %p3347_p2 = scmp.lt.s32.totalorder %s3341_s26, %s3341_s26 }
   0x6   :  { %p3348_p3 = por %p3347_p2, %p3346_p1 }
   0x8   :  { %p3349_p4 = pnand %p3348_p3, %p3342_p0 }
   0xa   :  { %3352 = shalt.err (!%p3349_p4)
}
   0xb   :  { %s3378_s27 = smov 128   ;;  %s3379_s28 = smov 8  }
   0xc   :  { %31 = dma.hbm_to_vmem [thread:$0]  %s4715_s3, 2048, %s26_s25, [#allocation3], %s3378_s27, %s3378_s27, %s3379_s28  }
   0xd   :  { %s3380_s8 = smov [#allocation4]  }
   0xe   :  { %s39_s9 = sshll.u32 %s3380_s8, 4  ;;  %s40_s9 = int_to_ptr.vmem [resolvable:$true] %s39_s9 }
   0xf   :  { %s3361_s10 = scalar_lea.vmem %s40_s9, 2048  ;;  %p3366_p6 = scmp.lt.s32.totalorder %s40_s9, %s40_s9 }
  0x10   :  { %p3362_p5 = scmp.ne.s32.totalorder %s40_s9, %s3361_s10  ;;  %p3367_p7 = scmp.lt.s32.totalorder %s3361_s10, %s3361_s10 }
  0x12   :  { %p3368_p8 = por %p3367_p7, %p3366_p6 }
  0x14   :  { %p3369_p9 = pnand %p3368_p8, %p3362_p5 }
  0x16   :  { %3372 = shalt.err (!%p3369_p9)
}
  0x17   :  { %45 = dma.hbm_to_vmem [thread:$0]  %s4717_s5, 2048, %s40_s9, [#allocation5], %s3378_s27, %s3378_s27, %s3379_s28  }
  0x18   :  { %3373 = dma.done.wait [#allocation3], 2048  }
  0x19   :  { %3374 = vsyncadd [#allocation3], 4294965248 }
  0x1a   :  { %3375 = dma.done.wait [#allocation5], 2048  }
  0x1b   :  { %3376 = vsyncadd [#allocation5], 4294965248  ;;  %v3381_v0 = vmov 0.0   ;;  %vm3382_vm0 = vmmov 0   ;;  %v3438_v1 = vld [vmem:[%s4713_s1 + $0x78] sm:$0xff]  ;;  %v3443_v2 = vld [vmem:[%s4713_s1 + $0x70] sm:$0xff] }
  0x1c   :  { %2371 = vmatprep.subr.mxu0 %v3381_v0  ;;  %2403 = vmatprep.mubr.msk.f32.mxu0 %vm3382_vm0, %v3381_v0  ;;  %v3450_v3 = vld [vmem:[%s4713_s1 + $0x68] sm:$0xff]  ;;  %v3457_v4 = vld [vmem:[%s4713_s1 + $0x60] sm:$0xff]  ;;  %v3460_v5 = vld [vmem:[#allocation2 + $0x78] sm:$0xff] }
  0x1d   :  { %2406 = vmatprep.subr.mxu1 %v3381_v0  ;;  %2438 = vmatprep.mubr.msk.f32.mxu1 %vm3382_vm0, %v3381_v0  ;;  %v3462_v6 = vld [vmem:[#allocation2 + $0x70] sm:$0xff]  ;;  %v3468_v7 = vld [vmem:[%s4713_s1 + $0x58] sm:$0xff]  ;;  %v3473_v8 = vld [vmem:[#allocation2 + $0x68] sm:$0xff] }
  0x1e   :  { %2372 = vmatpush3.msra.mxu0 %v3438_v1  ;;  %2407 = vmatpush3.msra.mxu1 %v3460_v5  ;;  %v3479_v9 = vld [vmem:[%s4713_s1 + $0x50] sm:$0xff]  ;;  %v3484_v10 = vld [vmem:[#allocation2 + $0x60] sm:$0xff]  ;;  %v3490_v11 = vld [vmem:[%s4713_s1 + $0x48] sm:$0xff] }
  0x1f   :  { %2373 = vmatprep.subr.mxu0 %v3381_v0  ;;  %2408 = vmatprep.subr.mxu1 %v3381_v0  ;;  %v3495_v12 = vld [vmem:[#allocation2 + $0x58] sm:$0xff]  ;;  %v3501_v13 = vld [vmem:[%s4713_s1 + $0x40] sm:$0xff]  ;;  %v3506_v14 = vld [vmem:[#allocation2 + $0x50] sm:$0xff] }
  0x20   :  { %2374 = vmatpush3.msra.mxu0 %v3443_v2  ;;  %2409 = vmatpush3.msra.mxu1 %v3462_v6  ;;  %v3512_v15 = vld [vmem:[%s4713_s1 + $0x38] sm:$0xff]  ;;  %v3517_v16 = vld [vmem:[#allocation2 + $0x48] sm:$0xff]  ;;  %v3523_v17 = vld [vmem:[%s4713_s1 + $0x30] sm:$0xff] }
  0x21   :  { %2375 = vmatprep.subr.mxu0 %v3381_v0  ;;  %2410 = vmatprep.subr.mxu1 %v3381_v0  ;;  %v3528_v18 = vld [vmem:[#allocation2 + $0x40] sm:$0xff]  ;;  %v3534_v19 = vld [vmem:[%s4713_s1 + $0x28] sm:$0xff]  ;;  %v3539_v20 = vld [vmem:[#allocation2 + $0x38] sm:$0xff] }
  0x22   :  { %2376 = vmatpush3.msra.mxu0 %v3450_v3  ;;  %2411 = vmatpush3.msra.mxu1 %v3473_v8  ;;  %v3545_v21 = vld [vmem:[%s4713_s1 + $0x20] sm:$0xff]  ;;  %v3550_v22 = vld [vmem:[#allocation2 + $0x30] sm:$0xff]  ;;  %v3556_v23 = vld [vmem:[%s4713_s1 + $0x18] sm:$0xff] }
  0x23   :  { %2377 = vmatprep.subr.mxu0 %v3381_v0  ;;  %2412 = vmatprep.subr.mxu1 %v3381_v0  ;;  %v3561_v24 = vld [vmem:[#allocation2 + $0x28] sm:$0xff]  ;;  %v3567_v25 = vld [vmem:[%s4713_s1 + $0x10] sm:$0xff]  ;;  %v3572_v26 = vld [vmem:[#allocation2 + $0x20] sm:$0xff] }
  0x24   :  { %2378 = vmatpush3.msra.mxu0 %v3457_v4  ;;  %2413 = vmatpush3.msra.mxu1 %v3484_v10  ;;  %v3578_v27 = vld [vmem:[%s4713_s1 + $0x8] sm:$0xff]  ;;  %v3583_v28 = vld [vmem:[#allocation2 + $0x18] sm:$0xff]  ;;  %v3589_v29 = vld [vmem:[%s4713_s1] sm:$0xff] }
  0x25   :  { %2379 = vmatprep.subr.mxu0 %v3381_v0  ;;  %2414 = vmatprep.subr.mxu1 %v3381_v0  ;;  %v3594_v30 = vld [vmem:[#allocation2 + $0x10] sm:$0xff]  ;;  %v3600_v31 = vld [vmem:[#allocation2 + $0x8] sm:$0xff]  ;;  %v3605_v32 = vld [vmem:[%s4714_s2 + $0x78] sm:$0xff] }
  0x26   :  { %2380 = vmatpush3.msra.mxu0 %v3468_v7  ;;  %2415 = vmatpush3.msra.mxu1 %v3495_v12  ;;  %v3610_v33 = vld [vmem:[#allocation2] sm:$0xff]  ;;  %v3616_v34 = vld [vmem:[%s4714_s2 + $0x70] sm:$0xff]  ;;  %v3627_v35 = vld [vmem:[%s4714_s2 + $0x68] sm:$0xff] }
  0x27   :  { %2381 = vmatprep.subr.mxu0 %v3381_v0  ;;  %2416 = vmatprep.subr.mxu1 %v3381_v0  ;;  %v3636_v36 = vld [vmem:[%s4714_s2 + $0x60] sm:$0xff]  ;;  %v3645_v37 = vld [vmem:[%s4714_s2 + $0x58] sm:$0xff]  ;;  %v3654_v38 = vld [vmem:[%s4714_s2 + $0x50] sm:$0xff] }
  0x28   :  { %2382 = vmatpush3.msra.mxu0 %v3479_v9  ;;  %2417 = vmatpush3.msra.mxu1 %v3506_v14  ;;  %v3663_v39 = vld [vmem:[%s4714_s2 + $0x48] sm:$0xff]  ;;  %v3701_v40 = vld [vmem:[%s4714_s2 + $0x40] sm:$0xff]  ;;  %v3708_v41 = vld [vmem:[%s4714_s2 + $0x38] sm:$0xff] }
  0x29   :  { %2383 = vmatprep.subr.mxu0 %v3381_v0  ;;  %2418 = vmatprep.subr.mxu1 %v3381_v0  ;;  %v3715_v42 = vld [vmem:[%s4714_s2 + $0x30] sm:$0xff]  ;;  %v3720_v43 = vld [vmem:[%s4714_s2 + $0x28] sm:$0xff]  ;;  %v3727_v44 = vld [vmem:[%s4714_s2 + $0x20] sm:$0xff] }
  0x2a   :  { %2384 = vmatpush3.msra.mxu0 %v3490_v11  ;;  %2419 = vmatpush3.msra.mxu1 %v3517_v16  ;;  %v3734_v45 = vld [vmem:[%s4714_s2 + $0x18] sm:$0xff]  ;;  %v3741_v46 = vld [vmem:[%s4714_s2 + $0x10] sm:$0xff]  ;;  %v3748_v47 = vld [vmem:[%s4714_s2 + $0x8] sm:$0xff] }
  0x2b   :  { %2385 = vmatprep.subr.mxu0 %v3381_v0  ;;  %2420 = vmatprep.subr.mxu1 %v3381_v0  ;;  %v3755_v48 = vld [vmem:[%s4714_s2] sm:$0xff]  ;;  %v1938_v56 = vld [vmem:[%s4712_s0 + $0x8] sm:$0xff] }
  0x2c   :  { %2386 = vmatpush3.msra.mxu0 %v3501_v13  ;;  %2421 = vmatpush3.msra.mxu1 %v3528_v18  ;;  %v61_v49 = vld [vmem:[%s4712_s0] sm:$0xff] }
  0x2d   :  { %2387 = vmatprep.subr.mxu0 %v3381_v0  ;;  %2422 = vmatprep.subr.mxu1 %v3381_v0  ;;  %v3840_v57 = vld [vmem:[%s4716_s4] ss:$0 sm:$0xff] }
  0x2e   :  { %2388 = vmatpush3.msra.mxu0 %v3512_v15  ;;  %2423 = vmatpush3.msra.mxu1 %v3539_v20 }
  0x2f   :  { %2389 = vmatprep.subr.mxu0 %v3381_v0  ;;  %2424 = vmatprep.subr.mxu1 %v3381_v0 }
  0x30   :  { %2390 = vmatpush3.msra.mxu0 %v3523_v17  ;;  %2425 = vmatpush3.msra.mxu1 %v3550_v22 }
  0x31   :  { %2391 = vmatprep.subr.mxu0 %v3381_v0  ;;  %2426 = vmatprep.subr.mxu1 %v3381_v0 }
  0x32   :  { %2392 = vmatpush3.msra.mxu0 %v3534_v19  ;;  %2427 = vmatpush3.msra.mxu1 %v3561_v24 }
  0x33   :  { %2393 = vmatprep.subr.mxu0 %v3381_v0  ;;  %2428 = vmatprep.subr.mxu1 %v3381_v0 }
  0x34   :  { %2394 = vmatpush3.msra.mxu0 %v3545_v21  ;;  %2429 = vmatpush3.msra.mxu1 %v3572_v26 }
  0x35   :  { %2395 = vmatprep.subr.mxu0 %v3381_v0  ;;  %2430 = vmatprep.subr.mxu1 %v3381_v0 }
  0x36   :  { %2396 = vmatpush3.msra.mxu0 %v3556_v23  ;;  %2431 = vmatpush3.msra.mxu1 %v3583_v28 }
  0x37   :  { %2397 = vmatprep.subr.mxu0 %v3381_v0  ;;  %2432 = vmatprep.subr.mxu1 %v3381_v0 }
  0x38   :  { %2398 = vmatpush3.msra.mxu0 %v3567_v25  ;;  %2433 = vmatpush3.msra.mxu1 %v3594_v30 }
  0x39   :  { %2399 = vmatprep.subr.mxu0 %v3381_v0  ;;  %2434 = vmatprep.subr.mxu1 %v3381_v0 }
  0x3a   :  { %2400 = vmatpush3.msra.mxu0 %v3578_v27  ;;  %2435 = vmatpush3.msra.mxu1 %v3600_v31 }
  0x3b   :  { %2401 = vmatprep.subr.mxu0 %v3381_v0  ;;  %2436 = vmatprep.subr.mxu1 %v3381_v0 }
  0x3c   :  { %2402 = vmatpush3.msra.mxu0 %v3589_v29  ;;  %2437 = vmatpush3.msra.mxu1 %v3610_v33 }
  0x3d   :  { %2404 = vmatmul.mubr.f32.vlgmr.msra.gmra.mxu0 %v3381_v0  ;;  %2441 = vmatprep.subr.mxu0 %v3381_v0 }
  0x3e   :  { %2442 = vmatpush3.msra.mxu0 %v3605_v32  ;;  %2476 = vmatprep.subr.mxu1 %v3381_v0 }
  0x3f   :  { %2443 = vmatprep.subr.mxu0 %v3381_v0  ;;  %2439 = vmatmul.mubr.f32.vlgmr.msra.gmra.mxu1 %v3381_v0 }
  0x40   :  { %2444 = vmatpush3.msra.mxu0 %v3616_v34  ;;  %2477 = vmatpush3.msra.mxu1 %v3438_v1 }
  0x41   :  { %2445 = vmatprep.subr.mxu0 %v3381_v0  ;;  %2478 = vmatprep.subr.mxu1 %v3381_v0 }
  0x42   :  { %2446 = vmatpush3.msra.mxu0 %v3627_v35  ;;  %2479 = vmatpush3.msra.mxu1 %v3443_v2 }
  0x43   :  { %2447 = vmatprep.subr.mxu0 %v3381_v0  ;;  %2480 = vmatprep.subr.mxu1 %v3381_v0 }
  0x44   :  { %2448 = vmatpush3.msra.mxu0 %v3636_v36  ;;  %2481 = vmatpush3.msra.mxu1 %v3450_v3 }
  0x45   :  { %2449 = vmatprep.subr.mxu0 %v3381_v0  ;;  %2482 = vmatprep.subr.mxu1 %v3381_v0 }
  0x46   :  { %2450 = vmatpush3.msra.mxu0 %v3645_v37  ;;  %2483 = vmatpush3.msra.mxu1 %v3457_v4 }
  0x47   :  { %2451 = vmatprep.subr.mxu0 %v3381_v0  ;;  %2484 = vmatprep.subr.mxu1 %v3381_v0 }
  0x48   :  { %2452 = vmatpush3.msra.mxu0 %v3654_v38  ;;  %2485 = vmatpush3.msra.mxu1 %v3468_v7 }
  0x49   :  { %2453 = vmatprep.subr.mxu0 %v3381_v0  ;;  %2486 = vmatprep.subr.mxu1 %v3381_v0 }
  0x4a   :  { %2454 = vmatpush3.msra.mxu0 %v3663_v39  ;;  %2487 = vmatpush3.msra.mxu1 %v3479_v9 }
  0x4b   :  { %2455 = vmatprep.subr.mxu0 %v3381_v0  ;;  %2488 = vmatprep.subr.mxu1 %v3381_v0 }
  0x4c   :  { %2473 = vmatprep.mubr.msk.f32.mxu0 %vm3382_vm0, %v3381_v0  ;;  %2489 = vmatpush3.msra.mxu1 %v3490_v11 }
  0x4d   :  { %2508 = vmatprep.mubr.msk.f32.mxu1 %vm3382_vm0, %v3381_v0  ;;  %2490 = vmatprep.subr.mxu1 %v3381_v0 }
  0x4e   :  { %2491 = vmatpush3.msra.mxu1 %v3501_v13  ;;  %2456 = vmatpush3.msra.mxu0 %v3701_v40 }
  0x4f   :  { %2492 = vmatprep.subr.mxu1 %v3381_v0  ;;  %2457 = vmatprep.subr.mxu0 %v3381_v0 }
  0x50   :  { %2493 = vmatpush3.msra.mxu1 %v3512_v15  ;;  %2458 = vmatpush3.msra.mxu0 %v3708_v41 }
  0x51   :  { %2494 = vmatprep.subr.mxu1 %v3381_v0  ;;  %2459 = vmatprep.subr.mxu0 %v3381_v0 }
  0x52   :  { %2495 = vmatpush3.msra.mxu1 %v3523_v17  ;;  %2460 = vmatpush3.msra.mxu0 %v3715_v42 }
  0x53   :  { %2496 = vmatprep.subr.mxu1 %v3381_v0  ;;  %2461 = vmatprep.subr.mxu0 %v3381_v0 }
  0x54   :  { %2497 = vmatpush3.msra.mxu1 %v3534_v19  ;;  %2462 = vmatpush3.msra.mxu0 %v3720_v43 }
  0x55   :  { %2498 = vmatprep.subr.mxu1 %v3381_v0  ;;  %2463 = vmatprep.subr.mxu0 %v3381_v0 }
  0x56   :  { %2499 = vmatpush3.msra.mxu1 %v3545_v21  ;;  %2464 = vmatpush3.msra.mxu0 %v3727_v44 }
  0x57   :  { %2500 = vmatprep.subr.mxu1 %v3381_v0  ;;  %2465 = vmatprep.subr.mxu0 %v3381_v0 }
  0x58   :  { %2501 = vmatpush3.msra.mxu1 %v3556_v23  ;;  %2466 = vmatpush3.msra.mxu0 %v3734_v45 }
  0x59   :  { %2502 = vmatprep.subr.mxu1 %v3381_v0  ;;  %2467 = vmatprep.subr.mxu0 %v3381_v0 }
  0x5a   :  { %2503 = vmatpush3.msra.mxu1 %v3567_v25  ;;  %2468 = vmatpush3.msra.mxu0 %v3741_v46 }
  0x5b   :  { %2504 = vmatprep.subr.mxu1 %v3381_v0  ;;  %2469 = vmatprep.subr.mxu0 %v3381_v0 }
  0x5c   :  { %2505 = vmatpush3.msra.mxu1 %v3578_v27  ;;  %2470 = vmatpush3.msra.mxu0 %v3748_v47 }
  0x5d   :  { %2506 = vmatprep.subr.mxu1 %v3381_v0  ;;  %2471 = vmatprep.subr.mxu0 %v3381_v0 }
  0x5e   :  { %2507 = vmatpush3.msra.mxu1 %v3589_v29  ;;  %2472 = vmatpush3.msra.mxu0 %v3755_v48 }
  0x5f   :  { %2546 = vmatprep.subr.mxu1 %v3381_v0  ;;  %2511 = vmatprep.subr.mxu0 %v3381_v0 }
  0xfd   :  { %v144_v50 = vpop.f32.mrf.mxu0 }
  0xfe   :  { %v148_v51 = vadd.f32 %v144_v50, %v61_v49 }
  0xff   :  { %v2405_v52 = vpop.f32.mrf.mxu0  ;;  %v3764_v53 = vpop.f32.mrf.mxu1 }
 0x100   :  { %3252 = vtanh.f32 %v148_v51 }
 0x101   :  { %v2440_v54 = vpop.f32.mrf.mxu1 }
 0x10d   :  { %v3253_v55 = vpop.eup %3252 }
 0x10e   :  { %2474 = vmatmul.mubr.f32.vlgmr.msra.gmra.mxu0 %v3253_v55  ;;  %2509 = vmatmul.mubr.f32.vlgmr.msra.gmra.mxu1 %v3253_v55 }
 0x10f   :  { %2547 = vmatpush3.msra.mxu1 %v3605_v32  ;;  %2512 = vmatpush3.msra.mxu0 %v3460_v5 }
 0x110   :  { %2548 = vmatprep.subr.mxu1 %v3381_v0  ;;  %2513 = vmatprep.subr.mxu0 %v3381_v0 }
 0x111   :  { %2549 = vmatpush3.msra.mxu1 %v3616_v34  ;;  %2514 = vmatpush3.msra.mxu0 %v3462_v6 }
 0x112   :  { %2550 = vmatprep.subr.mxu1 %v3381_v0  ;;  %2515 = vmatprep.subr.mxu0 %v3381_v0 }
 0x113   :  { %2551 = vmatpush3.msra.mxu1 %v3627_v35  ;;  %2516 = vmatpush3.msra.mxu0 %v3473_v8 }
 0x114   :  { %2552 = vmatprep.subr.mxu1 %v3381_v0  ;;  %2517 = vmatprep.subr.mxu0 %v3381_v0 }
 0x115   :  { %2553 = vmatpush3.msra.mxu1 %v3636_v36  ;;  %2518 = vmatpush3.msra.mxu0 %v3484_v10 }
 0x116   :  { %2554 = vmatprep.subr.mxu1 %v3381_v0  ;;  %2519 = vmatprep.subr.mxu0 %v3381_v0 }
 0x117   :  { %2555 = vmatpush3.msra.mxu1 %v3645_v37  ;;  %2520 = vmatpush3.msra.mxu0 %v3495_v12 }
 0x118   :  { %2556 = vmatprep.subr.mxu1 %v3381_v0  ;;  %2521 = vmatprep.subr.mxu0 %v3381_v0 }
 0x119   :  { %2557 = vmatpush3.msra.mxu1 %v3654_v38  ;;  %2522 = vmatpush3.msra.mxu0 %v3506_v14 }
 0x11a   :  { %2558 = vmatprep.subr.mxu1 %v3381_v0  ;;  %2523 = vmatprep.subr.mxu0 %v3381_v0 }
 0x11b   :  { %2559 = vmatpush3.msra.mxu1 %v3663_v39  ;;  %2524 = vmatpush3.msra.mxu0 %v3517_v16 }
 0x11c   :  { %2560 = vmatprep.subr.mxu1 %v3381_v0  ;;  %2525 = vmatprep.subr.mxu0 %v3381_v0 }
 0x11d   :  { %2561 = vmatpush3.msra.mxu1 %v3701_v40  ;;  %2526 = vmatpush3.msra.mxu0 %v3528_v18 }
 0x11e   :  { %2562 = vmatprep.subr.mxu1 %v3381_v0  ;;  %2527 = vmatprep.subr.mxu0 %v3381_v0 }
 0x11f   :  { %2563 = vmatpush3.msra.mxu1 %v3708_v41  ;;  %2528 = vmatpush3.msra.mxu0 %v3539_v20 }
 0x120   :  { %2564 = vmatprep.subr.mxu1 %v3381_v0  ;;  %2529 = vmatprep.subr.mxu0 %v3381_v0 }
 0x121   :  { %2565 = vmatpush3.msra.mxu1 %v3715_v42  ;;  %2530 = vmatpush3.msra.mxu0 %v3550_v22 }
 0x122   :  { %2566 = vmatprep.subr.mxu1 %v3381_v0  ;;  %2531 = vmatprep.subr.mxu0 %v3381_v0 }
 0x123   :  { %2567 = vmatpush3.msra.mxu1 %v3720_v43  ;;  %2532 = vmatpush3.msra.mxu0 %v3561_v24 }
 0x124   :  { %2568 = vmatprep.subr.mxu1 %v3381_v0  ;;  %2533 = vmatprep.subr.mxu0 %v3381_v0 }
 0x125   :  { %2569 = vmatpush3.msra.mxu1 %v3727_v44  ;;  %2534 = vmatpush3.msra.mxu0 %v3572_v26 }
 0x126   :  { %2570 = vmatprep.subr.mxu1 %v3381_v0  ;;  %2535 = vmatprep.subr.mxu0 %v3381_v0 }
 0x127   :  { %2571 = vmatpush3.msra.mxu1 %v3734_v45  ;;  %2536 = vmatpush3.msra.mxu0 %v3583_v28 }
 0x128   :  { %2572 = vmatprep.subr.mxu1 %v3381_v0  ;;  %2537 = vmatprep.subr.mxu0 %v3381_v0 }
 0x129   :  { %2573 = vmatpush3.msra.mxu1 %v3741_v46  ;;  %2538 = vmatpush3.msra.mxu0 %v3594_v30 }
 0x12a   :  { %2574 = vmatprep.subr.mxu1 %v3381_v0  ;;  %2539 = vmatprep.subr.mxu0 %v3381_v0 }
 0x12b   :  { %2575 = vmatpush3.msra.mxu1 %v3748_v47  ;;  %2540 = vmatpush3.msra.mxu0 %v3600_v31 }
 0x12c   :  { %2576 = vmatprep.subr.mxu1 %v3381_v0  ;;  %2541 = vmatprep.subr.mxu0 %v3381_v0 }
 0x12d   :  { %2577 = vmatpush3.msra.mxu1 %v3755_v48  ;;  %2578 = vmatprep.mubr.msk.f32.mxu1 %vm3382_vm0, %v3381_v0 }
 0x12e   :  { %2542 = vmatpush3.msra.mxu0 %v3610_v33  ;;  %2543 = vmatprep.mubr.msk.f32.mxu0 %vm3382_vm0, %v3381_v0 }
 0x12f   :  { %2581 = vmatprep.subr.mxu0 %v3381_v0  ;;  %2616 = vmatprep.subr.mxu1 %v3381_v0 }
 0x1ce   :  { %v318_v58 = vpop.f32.mrf.mxu0  ;;  %v392_v59 = vpop.f32.mrf.mxu1 }
 0x1cf   :  { %v319_v60 = vadd.f32 %v318_v58, %v3764_v53  ;;  %v396_v61 = vadd.f32 %v1938_v56, %v392_v59 }
 0x1d0   :  { %v2475_v62 = vpop.f32.mrf.mxu0  ;;  %v2510_v63 = vpop.f32.mrf.mxu1 }
 0x1d1   :  { %v322_v49 = vadd.f32 %v3840_v57, %v319_v60  ;;  %3254 = vtanh.f32 %v396_v61  ;;  %v1939_v60 = vld [vmem:[%s4712_s0 + $0x10] sm:$0xff] }
 0x1d3   :  { %3256 = vtanh.f32 %v322_v49 }
 0x1de   :  { %v3844_v50 = vpop.eup %3254 }
 0x1df   :  { %2579 = vmatmul.mubr.f32.vlgmr.msra.gmra.mxu1 %v3844_v50 }
 0x1e0   :  { %v3257_v51 = vpop.eup %3256  ;;  %2617 = vmatpush3.msra.mxu1 %v3460_v5  ;;  %2648 = vmatprep.mubr.msk.f32.mxu1 %vm3382_vm0, %v3381_v0 }
 0x1e1   :  { %2544 = vmatmul.mubr.f32.vlgmr.msra.gmra.mxu0 %v3257_v51  ;;  %2618 = vmatprep.subr.mxu1 %v3381_v0 }
 0x1e2   :  { %2582 = vmatpush3.msra.mxu0 %v3438_v1  ;;  %2613 = vmatprep.mubr.msk.f32.mxu0 %vm3382_vm0, %v3381_v0 }
 0x1e3   :  { %2583 = vmatprep.subr.mxu0 %v3381_v0  ;;  %2619 = vmatpush3.msra.mxu1 %v3462_v6 }
 0x1e4   :  { %2584 = vmatpush3.msra.mxu0 %v3443_v2  ;;  %2620 = vmatprep.subr.mxu1 %v3381_v0 }
 0x1e5   :  { %2585 = vmatprep.subr.mxu0 %v3381_v0  ;;  %2621 = vmatpush3.msra.mxu1 %v3473_v8 }
 0x1e6   :  { %2586 = vmatpush3.msra.mxu0 %v3450_v3  ;;  %2622 = vmatprep.subr.mxu1 %v3381_v0 }
 0x1e7   :  { %2587 = vmatprep.subr.mxu0 %v3381_v0  ;;  %2623 = vmatpush3.msra.mxu1 %v3484_v10 }
 0x1e8   :  { %2588 = vmatpush3.msra.mxu0 %v3457_v4  ;;  %2624 = vmatprep.subr.mxu1 %v3381_v0 }
 0x1e9   :  { %2589 = vmatprep.subr.mxu0 %v3381_v0  ;;  %2625 = vmatpush3.msra.mxu1 %v3495_v12 }
 0x1ea   :  { %2590 = vmatpush3.msra.mxu0 %v3468_v7  ;;  %2626 = vmatprep.subr.mxu1 %v3381_v0 }
 0x1eb   :  { %2591 = vmatprep.subr.mxu0 %v3381_v0  ;;  %2627 = vmatpush3.msra.mxu1 %v3506_v14 }
 0x1ec   :  { %2592 = vmatpush3.msra.mxu0 %v3479_v9  ;;  %2628 = vmatprep.subr.mxu1 %v3381_v0 }
 0x1ed   :  { %2593 = vmatprep.subr.mxu0 %v3381_v0  ;;  %2629 = vmatpush3.msra.mxu1 %v3517_v16 }
 0x1ee   :  { %2594 = vmatpush3.msra.mxu0 %v3490_v11  ;;  %2630 = vmatprep.subr.mxu1 %v3381_v0 }
 0x1ef   :  { %2595 = vmatprep.subr.mxu0 %v3381_v0  ;;  %2631 = vmatpush3.msra.mxu1 %v3528_v18 }
 0x1f0   :  { %2596 = vmatpush3.msra.mxu0 %v3501_v13  ;;  %2632 = vmatprep.subr.mxu1 %v3381_v0 }
 0x1f1   :  { %2597 = vmatprep.subr.mxu0 %v3381_v0  ;;  %2633 = vmatpush3.msra.mxu1 %v3539_v20 }
 0x1f2   :  { %2598 = vmatpush3.msra.mxu0 %v3512_v15  ;;  %2634 = vmatprep.subr.mxu1 %v3381_v0 }
 0x1f3   :  { %2599 = vmatprep.subr.mxu0 %v3381_v0  ;;  %2635 = vmatpush3.msra.mxu1 %v3550_v22 }
 0x1f4   :  { %2600 = vmatpush3.msra.mxu0 %v3523_v17  ;;  %2636 = vmatprep.subr.mxu1 %v3381_v0 }
 0x1f5   :  { %2601 = vmatprep.subr.mxu0 %v3381_v0  ;;  %2637 = vmatpush3.msra.mxu1 %v3561_v24 }
 0x1f6   :  { %2602 = vmatpush3.msra.mxu0 %v3534_v19  ;;  %2638 = vmatprep.subr.mxu1 %v3381_v0 }
 0x1f7   :  { %2603 = vmatprep.subr.mxu0 %v3381_v0  ;;  %2639 = vmatpush3.msra.mxu1 %v3572_v26 }
 0x1f8   :  { %2604 = vmatpush3.msra.mxu0 %v3545_v21  ;;  %2640 = vmatprep.subr.mxu1 %v3381_v0 }
 0x1f9   :  { %2605 = vmatprep.subr.mxu0 %v3381_v0  ;;  %2641 = vmatpush3.msra.mxu1 %v3583_v28 }
 0x1fa   :  { %2606 = vmatpush3.msra.mxu0 %v3556_v23  ;;  %2642 = vmatprep.subr.mxu1 %v3381_v0 }
 0x1fb   :  { %2607 = vmatprep.subr.mxu0 %v3381_v0  ;;  %2643 = vmatpush3.msra.mxu1 %v3594_v30 }
 0x1fc   :  { %2608 = vmatpush3.msra.mxu0 %v3567_v25  ;;  %2644 = vmatprep.subr.mxu1 %v3381_v0 }
 0x1fd   :  { %2609 = vmatprep.subr.mxu0 %v3381_v0  ;;  %2645 = vmatpush3.msra.mxu1 %v3600_v31 }
 0x1fe   :  { %2610 = vmatpush3.msra.mxu0 %v3578_v27  ;;  %2646 = vmatprep.subr.mxu1 %v3381_v0 }
 0x1ff   :  { %2611 = vmatprep.subr.mxu0 %v3381_v0  ;;  %2647 = vmatpush3.msra.mxu1 %v3610_v33 }
 0x200   :  { %2612 = vmatpush3.msra.mxu0 %v3589_v29  ;;  %2686 = vmatprep.subr.mxu1 %v3381_v0 }
 0x201   :  { %2614 = vmatmul.mubr.f32.vlgmr.msra.gmra.mxu0 %v3844_v50  ;;  %2651 = vmatprep.subr.mxu0 %v3381_v0 }
 0x202   :  { %2652 = vmatpush3.msra.mxu0 %v3605_v32  ;;  %2683 = vmatprep.mubr.msk.f32.mxu0 %vm3382_vm0, %v3381_v0 }
 0x203   :  { %2653 = vmatprep.subr.mxu0 %v3381_v0 }
 0x204   :  { %2654 = vmatpush3.msra.mxu0 %v3616_v34 }
 0x205   :  { %2655 = vmatprep.subr.mxu0 %v3381_v0 }
 0x206   :  { %2656 = vmatpush3.msra.mxu0 %v3627_v35 }
 0x207   :  { %2657 = vmatprep.subr.mxu0 %v3381_v0 }
 0x208   :  { %2658 = vmatpush3.msra.mxu0 %v3636_v36 }
 0x209   :  { %2659 = vmatprep.subr.mxu0 %v3381_v0 }
 0x20a   :  { %2660 = vmatpush3.msra.mxu0 %v3645_v37 }
 0x20b   :  { %2661 = vmatprep.subr.mxu0 %v3381_v0 }
 0x20c   :  { %2662 = vmatpush3.msra.mxu0 %v3654_v38 }
 0x20d   :  { %2663 = vmatprep.subr.mxu0 %v3381_v0 }
 0x20e   :  { %2664 = vmatpush3.msra.mxu0 %v3663_v39 }
 0x20f   :  { %2665 = vmatprep.subr.mxu0 %v3381_v0 }
 0x210   :  { %2666 = vmatpush3.msra.mxu0 %v3701_v40 }
 0x211   :  { %2667 = vmatprep.subr.mxu0 %v3381_v0 }
 0x212   :  { %2668 = vmatpush3.msra.mxu0 %v3708_v41 }
 0x213   :  { %2669 = vmatprep.subr.mxu0 %v3381_v0 }
 0x214   :  { %2670 = vmatpush3.msra.mxu0 %v3715_v42 }
 0x215   :  { %2671 = vmatprep.subr.mxu0 %v3381_v0 }
 0x216   :  { %2672 = vmatpush3.msra.mxu0 %v3720_v43 }
 0x217   :  { %2673 = vmatprep.subr.mxu0 %v3381_v0 }
 0x218   :  { %2674 = vmatpush3.msra.mxu0 %v3727_v44 }
 0x219   :  { %2675 = vmatprep.subr.mxu0 %v3381_v0 }
 0x21a   :  { %2676 = vmatpush3.msra.mxu0 %v3734_v45 }
 0x21b   :  { %2677 = vmatprep.subr.mxu0 %v3381_v0 }
 0x21c   :  { %2678 = vmatpush3.msra.mxu0 %v3741_v46 }
 0x21d   :  { %2679 = vmatprep.subr.mxu0 %v3381_v0 }
 0x21e   :  { %2680 = vmatpush3.msra.mxu0 %v3748_v47 }
 0x21f   :  { %2681 = vmatprep.subr.mxu0 %v3381_v0 }
 0x220   :  { %2682 = vmatpush3.msra.mxu0 %v3755_v48 }
 0x221   :  { %2721 = vmatprep.subr.mxu0 %v3381_v0 }
 0x29f   :  { %v534_v52 = vpop.f32.mrf.mxu1 }
 0x2a1   :  { %v464_v53 = vpop.f32.mrf.mxu0  ;;  %v2580_v54 = vpop.f32.mrf.mxu1 }
 0x2a2   :  { %v535_v55 = vadd.f32 %v534_v52, %v464_v53  ;;  %v1940_v53 = vld [vmem:[%s4712_s0 + $0x18] sm:$0xff] }
 0x2a3   :  { %v2545_v56 = vpop.f32.mrf.mxu0 }
 0x2a4   :  { %v538_v58 = vadd.f32 %v3840_v57, %v535_v55 }
 0x2a6   :  { %3258 = vtanh.f32 %v538_v58 }
 0x2b3   :  { %v3259_v59 = vpop.eup %3258 }
 0x2b4   :  { %2649 = vmatmul.mubr.f32.vlgmr.msra.gmra.mxu1 %v3259_v59 }
 0x2b5   :  { %2687 = vmatpush3.msra.mxu1 %v3438_v1  ;;  %2718 = vmatprep.mubr.msk.f32.mxu1 %vm3382_vm0, %v3381_v0 }
 0x2b6   :  { %2688 = vmatprep.subr.mxu1 %v3381_v0 }
 0x2b7   :  { %2689 = vmatpush3.msra.mxu1 %v3443_v2 }
 0x2b8   :  { %2690 = vmatprep.subr.mxu1 %v3381_v0 }
 0x2b9   :  { %2691 = vmatpush3.msra.mxu1 %v3450_v3 }
 0x2ba   :  { %2692 = vmatprep.subr.mxu1 %v3381_v0 }
 0x2bb   :  { %2693 = vmatpush3.msra.mxu1 %v3457_v4 }
 0x2bc   :  { %2694 = vmatprep.subr.mxu1 %v3381_v0 }
 0x2bd   :  { %2695 = vmatpush3.msra.mxu1 %v3468_v7 }
 0x2be   :  { %2696 = vmatprep.subr.mxu1 %v3381_v0 }
 0x2bf   :  { %2697 = vmatpush3.msra.mxu1 %v3479_v9 }
 0x2c0   :  { %2698 = vmatprep.subr.mxu1 %v3381_v0 }
 0x2c1   :  { %v608_v61 = vpop.f32.mrf.mxu0  ;;  %2699 = vmatpush3.msra.mxu1 %v3490_v11 }
 0x2c2   :  { %v612_v62 = vadd.f32 %v1939_v60, %v608_v61  ;;  %2700 = vmatprep.subr.mxu1 %v3381_v0 }
 0x2c3   :  { %v2615_v63 = vpop.f32.mrf.mxu0  ;;  %2701 = vmatpush3.msra.mxu1 %v3501_v13 }
 0x2c4   :  { %3260 = vtanh.f32 %v612_v62  ;;  %2702 = vmatprep.subr.mxu1 %v3381_v0  ;;  %v4393_v63 = vld [vmem:[#allocation2 + $0x28] sm:$0xff] }
 0x2c5   :  { %2703 = vmatpush3.msra.mxu1 %v3512_v15 }
 0x2c6   :  { %2704 = vmatprep.subr.mxu1 %v3381_v0 }
 0x2c7   :  { %2705 = vmatpush3.msra.mxu1 %v3523_v17 }
 0x2c8   :  { %2706 = vmatprep.subr.mxu1 %v3381_v0 }
 0x2c9   :  { %2707 = vmatpush3.msra.mxu1 %v3534_v19 }
 0x2ca   :  { %2708 = vmatprep.subr.mxu1 %v3381_v0 }
 0x2cb   :  { %2709 = vmatpush3.msra.mxu1 %v3545_v21 }
 0x2cc   :  { %2710 = vmatprep.subr.mxu1 %v3381_v0 }
 0x2cd   :  { %2711 = vmatpush3.msra.mxu1 %v3556_v23 }
 0x2ce   :  { %2712 = vmatprep.subr.mxu1 %v3381_v0 }
 0x2cf   :  { %2713 = vmatpush3.msra.mxu1 %v3567_v25 }
 0x2d0   :  { %2714 = vmatprep.subr.mxu1 %v3381_v0 }
 0x2d1   :  { %v3261_v49 = vpop.eup %3260  ;;  %2715 = vmatpush3.msra.mxu1 %v3578_v27 }
 0x2d2   :  { %2684 = vmatmul.mubr.f32.vlgmr.msra.gmra.mxu0 %v3261_v49  ;;  %2716 = vmatprep.subr.mxu1 %v3381_v0 }
 0x2d3   :  { %2717 = vmatpush3.msra.mxu1 %v3589_v29  ;;  %2722 = vmatpush3.msra.mxu0 %v3460_v5 }
 0x2d4   :  { %2719 = vmatmul.mubr.f32.vlgmr.msra.gmra.mxu1 %v3261_v49  ;;  %2756 = vmatprep.subr.mxu1 %v3381_v0  ;;  %v4401_v49 = vld [vmem:[%s4714_s2 + $0x28] sm:$0xff] }
 0x2d5   :  { %2723 = vmatprep.subr.mxu0 %v3381_v0  ;;  %2757 = vmatpush3.msra.mxu1 %v3605_v32 }
 0x2d6   :  { %2724 = vmatpush3.msra.mxu0 %v3462_v6  ;;  %2758 = vmatprep.subr.mxu1 %v3381_v0 }
 0x2d7   :  { %2725 = vmatprep.subr.mxu0 %v3381_v0  ;;  %2759 = vmatpush3.msra.mxu1 %v3616_v34 }
 0x2d8   :  { %2726 = vmatpush3.msra.mxu0 %v3473_v8  ;;  %2760 = vmatprep.subr.mxu1 %v3381_v0 }
 0x2d9   :  { %2727 = vmatprep.subr.mxu0 %v3381_v0  ;;  %2761 = vmatpush3.msra.mxu1 %v3627_v35 }
 0x2da   :  { %2728 = vmatpush3.msra.mxu0 %v3484_v10  ;;  %2762 = vmatprep.subr.mxu1 %v3381_v0 }
 0x2db   :  { %2729 = vmatprep.subr.mxu0 %v3381_v0  ;;  %2763 = vmatpush3.msra.mxu1 %v3636_v36 }
 0x2dc   :  { %2730 = vmatpush3.msra.mxu0 %v3495_v12  ;;  %2764 = vmatprep.subr.mxu1 %v3381_v0 }
 0x2dd   :  { %2731 = vmatprep.subr.mxu0 %v3381_v0  ;;  %2765 = vmatpush3.msra.mxu1 %v3645_v37 }
 0x2de   :  { %2732 = vmatpush3.msra.mxu0 %v3506_v14  ;;  %2766 = vmatprep.subr.mxu1 %v3381_v0 }
 0x2df   :  { %2733 = vmatprep.subr.mxu0 %v3381_v0  ;;  %2767 = vmatpush3.msra.mxu1 %v3654_v38 }
 0x2e0   :  { %2734 = vmatpush3.msra.mxu0 %v3517_v16  ;;  %2768 = vmatprep.subr.mxu1 %v3381_v0 }
 0x2e1   :  { %2735 = vmatprep.subr.mxu0 %v3381_v0  ;;  %2769 = vmatpush3.msra.mxu1 %v3663_v39 }
 0x2e2   :  { %2736 = vmatpush3.msra.mxu0 %v3528_v18  ;;  %2770 = vmatprep.subr.mxu1 %v3381_v0 }
 0x2e3   :  { %2737 = vmatprep.subr.mxu0 %v3381_v0  ;;  %2771 = vmatpush3.msra.mxu1 %v3701_v40 }
 0x2e4   :  { %2738 = vmatpush3.msra.mxu0 %v3539_v20  ;;  %2772 = vmatprep.subr.mxu1 %v3381_v0 }
 0x2e5   :  { %2739 = vmatprep.subr.mxu0 %v3381_v0  ;;  %2773 = vmatpush3.msra.mxu1 %v3708_v41 }
 0x2e6   :  { %2740 = vmatpush3.msra.mxu0 %v3550_v22  ;;  %2774 = vmatprep.subr.mxu1 %v3381_v0 }
 0x2e7   :  { %2741 = vmatprep.subr.mxu0 %v3381_v0  ;;  %2775 = vmatpush3.msra.mxu1 %v3715_v42 }
 0x2e8   :  { %2742 = vmatpush3.msra.mxu0 %v3561_v24  ;;  %2776 = vmatprep.subr.mxu1 %v3381_v0 }
 0x2e9   :  { %2743 = vmatprep.subr.mxu0 %v3381_v0  ;;  %2777 = vmatpush3.msra.mxu1 %v3720_v43 }
 0x2ea   :  { %2744 = vmatpush3.msra.mxu0 %v3572_v26  ;;  %2778 = vmatprep.subr.mxu1 %v3381_v0 }
 0x2eb   :  { %2745 = vmatprep.subr.mxu0 %v3381_v0  ;;  %2779 = vmatpush3.msra.mxu1 %v3727_v44 }
 0x2ec   :  { %2746 = vmatpush3.msra.mxu0 %v3583_v28  ;;  %2780 = vmatprep.subr.mxu1 %v3381_v0 }
 0x2ed   :  { %2747 = vmatprep.subr.mxu0 %v3381_v0  ;;  %2781 = vmatpush3.msra.mxu1 %v3734_v45 }
 0x2ee   :  { %2748 = vmatpush3.msra.mxu0 %v3594_v30  ;;  %2782 = vmatprep.subr.mxu1 %v3381_v0 }
 0x2ef   :  { %2749 = vmatprep.subr.mxu0 %v3381_v0  ;;  %2783 = vmatpush3.msra.mxu1 %v3741_v46 }
 0x2f0   :  { %2750 = vmatpush3.msra.mxu0 %v3600_v31  ;;  %2784 = vmatprep.subr.mxu1 %v3381_v0 }
 0x2f1   :  { %2751 = vmatprep.subr.mxu0 %v3381_v0  ;;  %2785 = vmatpush3.msra.mxu1 %v3748_v47 }
 0x2f2   :  { %2752 = vmatpush3.msra.mxu0 %v3610_v33  ;;  %2786 = vmatprep.subr.mxu1 %v3381_v0 }
 0x2f3   :  { %2753 = vmatprep.mubr.msk.f32.mxu0 %vm3382_vm0, %v3381_v0  ;;  %2787 = vmatpush3.msra.mxu1 %v3755_v48 }
 0x2f4   :  { %2788 = vmatprep.mubr.msk.f32.mxu1 %vm3382_vm0, %v3381_v0  ;;  %2791 = vmatprep.subr.mxu0 %v3381_v0 }
 0x2f5   :  { %2826 = vmatprep.subr.mxu1 %v3381_v0 }
 0x374   :  { %v680_v50 = vpop.f32.mrf.mxu1 }
 0x376   :  { %v2650_v51 = vpop.f32.mrf.mxu1 }
 0x377   :  { %v4412_v51 = vld [vmem:[%s4714_s2 + $0x20] sm:$0xff] }
 0x392   :  { %v750_v52 = vpop.f32.mrf.mxu0 }
 0x393   :  { %v751_v54 = vadd.f32 %v750_v52, %v680_v50  ;;  %v4404_v50 = vld [vmem:[#allocation2 + $0x20] sm:$0xff]  ;;  %v4415_v52 = vld [vmem:[#allocation2 + $0x18] sm:$0xff] }
 0x394   :  { %v2685_v55 = vpop.f32.mrf.mxu0  ;;  %v824_v56 = vpop.f32.mrf.mxu1 }
 0x395   :  { %v754_v58 = vadd.f32 %v3840_v57, %v751_v54  ;;  %v828_v59 = vadd.f32 %v1940_v53, %v824_v56  ;;  %v4423_v53 = vld [vmem:[%s4714_s2 + $0x18] sm:$0xff]  ;;  %v4426_v54 = vld [vmem:[#allocation2 + $0x10] sm:$0xff]  ;;  %v4437_v56 = vld [vmem:[#allocation2 + $0x8] sm:$0xff] }
 0x396   :  { %v2720_v60 = vpop.f32.mrf.mxu1  ;;  %v4434_v55 = vld [vmem:[%s4714_s2 + $0x10] sm:$0xff] }
 0x397   :  { %3262 = vtanh.f32 %v754_v58  ;;  %v4445_v58 = vld [vmem:[%s4714_s2 + $0x8] sm:$0xff]  ;;  %v4457_v60 = vld [vmem:[%s4714_s2] sm:$0xff] }
 0x398   :  { %3264 = vtanh.f32 %v828_v59  ;;  %v4448_v59 = vld [vmem:[#allocation2] sm:$0xff] }
 0x3a4   :  { %v3263_v61 = vpop.eup %3262 }
 0x3a5   :  { %v4060_v62 = vpop.eup %3264  ;;  %2754 = vmatmul.mubr.f32.vlgmr.msra.gmra.mxu0 %v3263_v61 }
 0x3a6   :  { %2789 = vmatmul.mubr.f32.vlgmr.msra.gmra.mxu1 %v4060_v62  ;;  %2792 = vmatpush3.msra.mxu0 %v3438_v1 }
 0x3a7   :  { %2793 = vmatprep.subr.mxu0 %v3381_v0  ;;  %2823 = vmatprep.mubr.msk.f32.mxu0 %vm3382_vm0, %v3381_v0 }
 0x3a8   :  { %2794 = vmatpush3.msra.mxu0 %v3443_v2  ;;  %2827 = vmatpush3.msra.mxu1 %v3460_v5 }
 0x3a9   :  { %2795 = vmatprep.subr.mxu0 %v3381_v0  ;;  %2828 = vmatprep.subr.mxu1 %v3381_v0 }
 0x3aa   :  { %2796 = vmatpush3.msra.mxu0 %v3450_v3  ;;  %2829 = vmatpush3.msra.mxu1 %v3462_v6 }
 0x3ab   :  { %2797 = vmatprep.subr.mxu0 %v3381_v0  ;;  %2830 = vmatprep.subr.mxu1 %v3381_v0 }
 0x3ac   :  { %2798 = vmatpush3.msra.mxu0 %v3457_v4  ;;  %2831 = vmatpush3.msra.mxu1 %v3473_v8  ;;  %v4170_v8 = vld [vmem:[%s4713_s1 + $0x78] sm:$0xff] }
 0x3ad   :  { %2799 = vmatprep.subr.mxu0 %v3381_v0  ;;  %2832 = vmatprep.subr.mxu1 %v3381_v0 }
 0x3ae   :  { %2800 = vmatpush3.msra.mxu0 %v3468_v7  ;;  %2833 = vmatpush3.msra.mxu1 %v3484_v10  ;;  %v4186_v10 = vld [vmem:[%s4713_s1 + $0x68] sm:$0xff] }
 0x3af   :  { %2801 = vmatprep.subr.mxu0 %v3381_v0  ;;  %2834 = vmatprep.subr.mxu1 %v3381_v0 }
 0x3b0   :  { %2802 = vmatpush3.msra.mxu0 %v3479_v9  ;;  %2835 = vmatpush3.msra.mxu1 %v3495_v12  ;;  %v4179_v9 = vld [vmem:[%s4713_s1 + $0x70] sm:$0xff]  ;;  %v4200_v12 = vld [vmem:[%s4713_s1 + $0x58] sm:$0xff] }
 0x3b1   :  { %2803 = vmatprep.subr.mxu0 %v3381_v0  ;;  %2836 = vmatprep.subr.mxu1 %v3381_v0 }
 0x3b2   :  { %2804 = vmatpush3.msra.mxu0 %v3490_v11  ;;  %2837 = vmatpush3.msra.mxu1 %v3506_v14  ;;  %v4193_v11 = vld [vmem:[%s4713_s1 + $0x60] sm:$0xff]  ;;  %v4210_v14 = vld [vmem:[%s4713_s1 + $0x50] sm:$0xff] }
 0x3b3   :  { %2805 = vmatprep.subr.mxu0 %v3381_v0  ;;  %2838 = vmatprep.subr.mxu1 %v3381_v0 }
 0x3b4   :  { %2806 = vmatpush3.msra.mxu0 %v3501_v13  ;;  %2839 = vmatpush3.msra.mxu1 %v3517_v16  ;;  %v1941_v13 = vld [vmem:[%s4712_s0 + $0x20] sm:$0xff] }
 0x3b5   :  { %2807 = vmatprep.subr.mxu0 %v3381_v0  ;;  %2840 = vmatprep.subr.mxu1 %v3381_v0 }
 0x3b6   :  { %2808 = vmatpush3.msra.mxu0 %v3512_v15  ;;  %2841 = vmatpush3.msra.mxu1 %v3528_v18 }
 0x3b7   :  { %2809 = vmatprep.subr.mxu0 %v3381_v0  ;;  %2842 = vmatprep.subr.mxu1 %v3381_v0 }
 0x3b8   :  { %2810 = vmatpush3.msra.mxu0 %v3523_v17  ;;  %2843 = vmatpush3.msra.mxu1 %v3539_v20  ;;  %v4217_v17 = vld [vmem:[%s4713_s1 + $0x48] sm:$0xff]  ;;  %v4231_v20 = vld [vmem:[%s4713_s1 + $0x38] sm:$0xff] }
 0x3b9   :  { %2811 = vmatprep.subr.mxu0 %v3381_v0  ;;  %2844 = vmatprep.subr.mxu1 %v3381_v0 }
 0x3ba   :  { %2812 = vmatpush3.msra.mxu0 %v3534_v19  ;;  %2845 = vmatpush3.msra.mxu1 %v3550_v22  ;;  %v4224_v19 = vld [vmem:[%s4713_s1 + $0x40] sm:$0xff]  ;;  %v4245_v22 = vld [vmem:[%s4713_s1 + $0x28] sm:$0xff] }
 0x3bb   :  { %2813 = vmatprep.subr.mxu0 %v3381_v0  ;;  %2846 = vmatprep.subr.mxu1 %v3381_v0 }
 0x3bc   :  { %2814 = vmatpush3.msra.mxu0 %v3545_v21  ;;  %2847 = vmatpush3.msra.mxu1 %v3561_v24  ;;  %v4238_v21 = vld [vmem:[%s4713_s1 + $0x30] sm:$0xff]  ;;  %v4259_v24 = vld [vmem:[%s4713_s1 + $0x18] sm:$0xff] }
 0x3bd   :  { %2815 = vmatprep.subr.mxu0 %v3381_v0  ;;  %2848 = vmatprep.subr.mxu1 %v3381_v0 }
 0x3be   :  { %2816 = vmatpush3.msra.mxu0 %v3556_v23  ;;  %2849 = vmatpush3.msra.mxu1 %v3572_v26  ;;  %v4252_v23 = vld [vmem:[%s4713_s1 + $0x20] sm:$0xff] }
 0x3bf   :  { %2817 = vmatprep.subr.mxu0 %v3381_v0  ;;  %2850 = vmatprep.subr.mxu1 %v3381_v0 }
 0x3c0   :  { %2818 = vmatpush3.msra.mxu0 %v3567_v25  ;;  %2851 = vmatpush3.msra.mxu1 %v3583_v28  ;;  %v4266_v25 = vld [vmem:[%s4713_s1 + $0x10] sm:$0xff]  ;;  %v4277_v28 = vld [vmem:[#allocation2 + $0x78] sm:$0xff] }
 0x3c1   :  { %2819 = vmatprep.subr.mxu0 %v3381_v0  ;;  %2852 = vmatprep.subr.mxu1 %v3381_v0 }
 0x3c2   :  { %2820 = vmatpush3.msra.mxu0 %v3578_v27  ;;  %2853 = vmatpush3.msra.mxu1 %v3594_v30  ;;  %v4273_v27 = vld [vmem:[%s4713_s1 + $0x8] sm:$0xff]  ;;  %v4291_v30 = vld [vmem:[%s4714_s2 + $0x78] sm:$0xff] }
 0x3c3   :  { %2821 = vmatprep.subr.mxu0 %v3381_v0  ;;  %2854 = vmatprep.subr.mxu1 %v3381_v0 }
 0x3c4   :  { %2822 = vmatpush3.msra.mxu0 %v3589_v29  ;;  %2855 = vmatpush3.msra.mxu1 %v3600_v31  ;;  %v4283_v29 = vld [vmem:[%s4713_s1] sm:$0xff]  ;;  %v4294_v31 = vld [vmem:[#allocation2 + $0x70] sm:$0xff] }
 0x3c5   :  { %2824 = vmatmul.mubr.f32.vlgmr.msra.gmra.mxu0 %v4060_v62  ;;  %2856 = vmatprep.subr.mxu1 %v3381_v0 }
 0x3c6   :  { %2861 = vmatprep.subr.mxu0 %v3381_v0  ;;  %2857 = vmatpush3.msra.mxu1 %v3610_v33  ;;  %v4305_v33 = vld [vmem:[#allocation2 + $0x68] sm:$0xff] }
 0x3c7   :  { %2862 = vmatpush3.msra.mxu0 %v3605_v32  ;;  %2858 = vmatprep.mubr.msk.f32.mxu1 %vm3382_vm0, %v3381_v0  ;;  %v4302_v32 = vld [vmem:[%s4714_s2 + $0x70] sm:$0xff] }
 0x3c8   :  { %2863 = vmatprep.subr.mxu0 %v3381_v0  ;;  %2896 = vmatprep.subr.mxu1 %v3381_v0 }
 0x3c9   :  { %2864 = vmatpush3.msra.mxu0 %v3616_v34  ;;  %2893 = vmatprep.mubr.msk.f32.mxu0 %vm3382_vm0, %v3381_v0  ;;  %v4313_v34 = vld [vmem:[%s4714_s2 + $0x68] sm:$0xff] }
 0x3ca   :  { %2865 = vmatprep.subr.mxu0 %v3381_v0 }
 0x3cb   :  { %2866 = vmatpush3.msra.mxu0 %v3627_v35  ;;  %v4316_v35 = vld [vmem:[#allocation2 + $0x60] sm:$0xff] }
 0x3cc   :  { %2867 = vmatprep.subr.mxu0 %v3381_v0 }
 0x3cd   :  { %2868 = vmatpush3.msra.mxu0 %v3636_v36  ;;  %v4324_v36 = vld [vmem:[%s4714_s2 + $0x60] sm:$0xff] }
 0x3ce   :  { %2869 = vmatprep.subr.mxu0 %v3381_v0 }
 0x3cf   :  { %2870 = vmatpush3.msra.mxu0 %v3645_v37  ;;  %v4327_v37 = vld [vmem:[#allocation2 + $0x58] sm:$0xff] }
 0x3d0   :  { %2871 = vmatprep.subr.mxu0 %v3381_v0 }
 0x3d1   :  { %2872 = vmatpush3.msra.mxu0 %v3654_v38  ;;  %v4335_v38 = vld [vmem:[%s4714_s2 + $0x58] sm:$0xff] }
 0x3d2   :  { %2873 = vmatprep.subr.mxu0 %v3381_v0 }
 0x3d3   :  { %2874 = vmatpush3.msra.mxu0 %v3663_v39  ;;  %v4338_v39 = vld [vmem:[#allocation2 + $0x50] sm:$0xff] }
 0x3d4   :  { %2875 = vmatprep.subr.mxu0 %v3381_v0 }
 0x3d5   :  { %2876 = vmatpush3.msra.mxu0 %v3701_v40  ;;  %v4346_v40 = vld [vmem:[%s4714_s2 + $0x50] sm:$0xff] }
 0x3d6   :  { %2877 = vmatprep.subr.mxu0 %v3381_v0 }
 0x3d7   :  { %2878 = vmatpush3.msra.mxu0 %v3708_v41  ;;  %v4349_v41 = vld [vmem:[#allocation2 + $0x48] sm:$0xff] }
 0x3d8   :  { %2879 = vmatprep.subr.mxu0 %v3381_v0 }
 0x3d9   :  { %2880 = vmatpush3.msra.mxu0 %v3715_v42  ;;  %v4357_v42 = vld [vmem:[%s4714_s2 + $0x48] sm:$0xff] }
 0x3da   :  { %2881 = vmatprep.subr.mxu0 %v3381_v0 }
 0x3db   :  { %2882 = vmatpush3.msra.mxu0 %v3720_v43  ;;  %v4360_v43 = vld [vmem:[#allocation2 + $0x40] sm:$0xff] }
 0x3dc   :  { %2883 = vmatprep.subr.mxu0 %v3381_v0 }
 0x3dd   :  { %2884 = vmatpush3.msra.mxu0 %v3727_v44  ;;  %v4368_v44 = vld [vmem:[%s4714_s2 + $0x40] sm:$0xff] }
 0x3de   :  { %2885 = vmatprep.subr.mxu0 %v3381_v0 }
 0x3df   :  { %2886 = vmatpush3.msra.mxu0 %v3734_v45  ;;  %v4371_v45 = vld [vmem:[#allocation2 + $0x38] sm:$0xff] }
 0x3e0   :  { %2887 = vmatprep.subr.mxu0 %v3381_v0 }
 0x3e1   :  { %2888 = vmatpush3.msra.mxu0 %v3741_v46  ;;  %v4379_v46 = vld [vmem:[%s4714_s2 + $0x38] sm:$0xff] }
 0x3e2   :  { %2889 = vmatprep.subr.mxu0 %v3381_v0 }
 0x3e3   :  { %2890 = vmatpush3.msra.mxu0 %v3748_v47  ;;  %v4382_v47 = vld [vmem:[#allocation2 + $0x30] sm:$0xff] }
 0x3e4   :  { %2891 = vmatprep.subr.mxu0 %v3381_v0 }
 0x3e5   :  { %2892 = vmatpush3.msra.mxu0 %v3755_v48  ;;  %v4390_v48 = vld [vmem:[%s4714_s2 + $0x30] sm:$0xff] }
 0x3e6   :  { %2931 = vmatprep.subr.mxu0 %v3381_v0 }
 0x465   :  { %v896_v1 = vpop.f32.mrf.mxu0 }
 0x466   :  { %v966_v2 = vpop.f32.mrf.mxu1 }
 0x467   :  { %v967_v3 = vadd.f32 %v966_v2, %v896_v1  ;;  %v2755_v4 = vpop.f32.mrf.mxu0 }
 0x468   :  { %v2790_v5 = vpop.f32.mrf.mxu1 }
 0x469   :  { %v970_v6 = vadd.f32 %v3840_v57, %v967_v3  ;;  %v1942_v3 = vld [vmem:[%s4712_s0 + $0x28] sm:$0xff] }
 0x46b   :  { %3266 = vtanh.f32 %v970_v6 }
 0x478   :  { %v3267_v7 = vpop.eup %3266 }
 0x479   :  { %2859 = vmatmul.mubr.f32.vlgmr.msra.gmra.mxu1 %v3267_v7 }
 0x47a   :  { %2897 = vmatpush3.msra.mxu1 %v4170_v8  ;;  %2928 = vmatprep.mubr.msk.f32.mxu1 %vm3382_vm0, %v3381_v0 }
 0x47b   :  { %2898 = vmatprep.subr.mxu1 %v3381_v0 }
 0x47c   :  { %2899 = vmatpush3.msra.mxu1 %v4179_v9 }
 0x47d   :  { %2900 = vmatprep.subr.mxu1 %v3381_v0 }
 0x47e   :  { %2901 = vmatpush3.msra.mxu1 %v4186_v10 }
 0x47f   :  { %2902 = vmatprep.subr.mxu1 %v3381_v0 }
 0x480   :  { %2903 = vmatpush3.msra.mxu1 %v4193_v11 }
 0x481   :  { %2904 = vmatprep.subr.mxu1 %v3381_v0 }
 0x482   :  { %2905 = vmatpush3.msra.mxu1 %v4200_v12 }
 0x483   :  { %2906 = vmatprep.subr.mxu1 %v3381_v0 }
 0x484   :  { %2907 = vmatpush3.msra.mxu1 %v4210_v14 }
 0x485   :  { %2908 = vmatprep.subr.mxu1 %v3381_v0  ;;  %v1040_v15 = vpop.f32.mrf.mxu0 }
 0x486   :  { %v1044_v16 = vadd.f32 %v1941_v13, %v1040_v15  ;;  %2909 = vmatpush3.msra.mxu1 %v4217_v17 }
 0x487   :  { %2910 = vmatprep.subr.mxu1 %v3381_v0  ;;  %v2825_v18 = vpop.f32.mrf.mxu0 }
 0x488   :  { %3268 = vtanh.f32 %v1044_v16  ;;  %2911 = vmatpush3.msra.mxu1 %v4224_v19 }
 0x489   :  { %2912 = vmatprep.subr.mxu1 %v3381_v0 }
 0x48a   :  { %2913 = vmatpush3.msra.mxu1 %v4231_v20 }
 0x48b   :  { %2914 = vmatprep.subr.mxu1 %v3381_v0 }
 0x48c   :  { %2915 = vmatpush3.msra.mxu1 %v4238_v21 }
 0x48d   :  { %2916 = vmatprep.subr.mxu1 %v3381_v0 }
 0x48e   :  { %2917 = vmatpush3.msra.mxu1 %v4245_v22 }
 0x48f   :  { %2918 = vmatprep.subr.mxu1 %v3381_v0 }
 0x490   :  { %2919 = vmatpush3.msra.mxu1 %v4252_v23 }
 0x491   :  { %2920 = vmatprep.subr.mxu1 %v3381_v0 }
 0x492   :  { %2921 = vmatpush3.msra.mxu1 %v4259_v24 }
 0x493   :  { %2922 = vmatprep.subr.mxu1 %v3381_v0 }
 0x494   :  { %2923 = vmatpush3.msra.mxu1 %v4266_v25 }
 0x495   :  { %v3269_v26 = vpop.eup %3268  ;;  %2924 = vmatprep.subr.mxu1 %v3381_v0 }
 0x496   :  { %2925 = vmatpush3.msra.mxu1 %v4273_v27  ;;  %2894 = vmatmul.mubr.f32.vlgmr.msra.gmra.mxu0 %v3269_v26 }
 0x497   :  { %2926 = vmatprep.subr.mxu1 %v3381_v0  ;;  %2932 = vmatpush3.msra.mxu0 %v4277_v28 }
 0x498   :  { %2927 = vmatpush3.msra.mxu1 %v4283_v29  ;;  %2933 = vmatprep.subr.mxu0 %v3381_v0 }
 0x499   :  { %2929 = vmatmul.mubr.f32.vlgmr.msra.gmra.mxu1 %v3269_v26  ;;  %2966 = vmatprep.subr.mxu1 %v3381_v0 }
 0x49a   :  { %2967 = vmatpush3.msra.mxu1 %v4291_v30  ;;  %2934 = vmatpush3.msra.mxu0 %v4294_v31 }
 0x49b   :  { %2968 = vmatprep.subr.mxu1 %v3381_v0  ;;  %2935 = vmatprep.subr.mxu0 %v3381_v0 }
 0x49c   :  { %2969 = vmatpush3.msra.mxu1 %v4302_v32  ;;  %2936 = vmatpush3.msra.mxu0 %v4305_v33 }
 0x49d   :  { %2970 = vmatprep.subr.mxu1 %v3381_v0  ;;  %2937 = vmatprep.subr.mxu0 %v3381_v0 }
 0x49e   :  { %2971 = vmatpush3.msra.mxu1 %v4313_v34  ;;  %2938 = vmatpush3.msra.mxu0 %v4316_v35 }
 0x49f   :  { %2972 = vmatprep.subr.mxu1 %v3381_v0  ;;  %2939 = vmatprep.subr.mxu0 %v3381_v0 }
 0x4a0   :  { %2973 = vmatpush3.msra.mxu1 %v4324_v36  ;;  %2940 = vmatpush3.msra.mxu0 %v4327_v37 }
 0x4a1   :  { %2974 = vmatprep.subr.mxu1 %v3381_v0  ;;  %2941 = vmatprep.subr.mxu0 %v3381_v0 }
 0x4a2   :  { %2975 = vmatpush3.msra.mxu1 %v4335_v38  ;;  %2942 = vmatpush3.msra.mxu0 %v4338_v39 }
 0x4a3   :  { %2976 = vmatprep.subr.mxu1 %v3381_v0  ;;  %2943 = vmatprep.subr.mxu0 %v3381_v0 }
 0x4a4   :  { %2977 = vmatpush3.msra.mxu1 %v4346_v40  ;;  %2944 = vmatpush3.msra.mxu0 %v4349_v41 }
 0x4a5   :  { %2978 = vmatprep.subr.mxu1 %v3381_v0  ;;  %2945 = vmatprep.subr.mxu0 %v3381_v0 }
 0x4a6   :  { %2979 = vmatpush3.msra.mxu1 %v4357_v42  ;;  %2946 = vmatpush3.msra.mxu0 %v4360_v43 }
 0x4a7   :  { %2980 = vmatprep.subr.mxu1 %v3381_v0  ;;  %2947 = vmatprep.subr.mxu0 %v3381_v0 }
 0x4a8   :  { %2981 = vmatpush3.msra.mxu1 %v4368_v44  ;;  %2948 = vmatpush3.msra.mxu0 %v4371_v45 }
 0x4a9   :  { %2982 = vmatprep.subr.mxu1 %v3381_v0  ;;  %2949 = vmatprep.subr.mxu0 %v3381_v0 }
 0x4aa   :  { %2983 = vmatpush3.msra.mxu1 %v4379_v46  ;;  %2950 = vmatpush3.msra.mxu0 %v4382_v47 }
 0x4ab   :  { %2984 = vmatprep.subr.mxu1 %v3381_v0  ;;  %2951 = vmatprep.subr.mxu0 %v3381_v0 }
 0x4ac   :  { %2985 = vmatpush3.msra.mxu1 %v4390_v48  ;;  %2952 = vmatpush3.msra.mxu0 %v4393_v63 }
 0x4ad   :  { %2986 = vmatprep.subr.mxu1 %v3381_v0  ;;  %2953 = vmatprep.subr.mxu0 %v3381_v0 }
 0x4ae   :  { %2987 = vmatpush3.msra.mxu1 %v4401_v49  ;;  %2954 = vmatpush3.msra.mxu0 %v4404_v50 }
 0x4af   :  { %2988 = vmatprep.subr.mxu1 %v3381_v0  ;;  %2955 = vmatprep.subr.mxu0 %v3381_v0 }
 0x4b0   :  { %2989 = vmatpush3.msra.mxu1 %v4412_v51  ;;  %2956 = vmatpush3.msra.mxu0 %v4415_v52 }
 0x4b1   :  { %2990 = vmatprep.subr.mxu1 %v3381_v0  ;;  %2957 = vmatprep.subr.mxu0 %v3381_v0 }
 0x4b2   :  { %2991 = vmatpush3.msra.mxu1 %v4423_v53  ;;  %2958 = vmatpush3.msra.mxu0 %v4426_v54 }
 0x4b3   :  { %2992 = vmatprep.subr.mxu1 %v3381_v0  ;;  %2959 = vmatprep.subr.mxu0 %v3381_v0 }
 0x4b4   :  { %2993 = vmatpush3.msra.mxu1 %v4434_v55  ;;  %2960 = vmatpush3.msra.mxu0 %v4437_v56 }
 0x4b5   :  { %2994 = vmatprep.subr.mxu1 %v3381_v0  ;;  %2961 = vmatprep.subr.mxu0 %v3381_v0 }
 0x4b6   :  { %2995 = vmatpush3.msra.mxu1 %v4445_v58  ;;  %2962 = vmatpush3.msra.mxu0 %v4448_v59 }
 0x4b7   :  { %2996 = vmatprep.subr.mxu1 %v3381_v0  ;;  %2963 = vmatprep.mubr.msk.f32.mxu0 %vm3382_vm0, %v3381_v0 }
 0x4b8   :  { %2997 = vmatpush3.msra.mxu1 %v4457_v60  ;;  %2998 = vmatprep.mubr.msk.f32.mxu1 %vm3382_vm0, %v3381_v0 }
 0x4b9   :  { %3001 = vmatprep.subr.mxu0 %v3381_v0  ;;  %3036 = vmatprep.subr.mxu1 %v3381_v0 }
 0x539   :  { %v1112_v61 = vpop.f32.mrf.mxu1 }
 0x53b   :  { %v2860_v62 = vpop.f32.mrf.mxu1 }
 0x556   :  { %v1182_v1 = vpop.f32.mrf.mxu0 }
 0x557   :  { %v1183_v2 = vadd.f32 %v1182_v1, %v1112_v61  ;;  %v4577_v1 = vld [vmem:[%s4716_s4] ss:$0 sm:$0xff] }
 0x558   :  { %v2895_v4 = vpop.f32.mrf.mxu0 }
 0x559   :  { %v1186_v5 = vadd.f32 %v3840_v57, %v1183_v2  ;;  %v1256_v6 = vpop.f32.mrf.mxu1 }
 0x55a   :  { %v1260_v7 = vadd.f32 %v1942_v3, %v1256_v6 }
 0x55b   :  { %3270 = vtanh.f32 %v1186_v5  ;;  %v2930_v13 = vpop.f32.mrf.mxu1 }
 0x55c   :  { %3272 = vtanh.f32 %v1260_v7 }
 0x568   :  { %v3271_v15 = vpop.eup %3270 }
 0x569   :  { %v4468_v16 = vpop.eup %3272  ;;  %2964 = vmatmul.mubr.f32.vlgmr.msra.gmra.mxu0 %v3271_v15 }
 0x56a   :  { %2999 = vmatmul.mubr.f32.vlgmr.msra.gmra.mxu1 %v4468_v16  ;;  %3002 = vmatpush3.msra.mxu0 %v4170_v8 }
 0x56b   :  { %3003 = vmatprep.subr.mxu0 %v3381_v0  ;;  %3033 = vmatprep.mubr.msk.f32.mxu0 %vm3382_vm0, %v3381_v0 }
 0x56c   :  { %3004 = vmatpush3.msra.mxu0 %v4179_v9  ;;  %3037 = vmatpush3.msra.mxu1 %v4277_v28 }
 0x56d   :  { %3005 = vmatprep.subr.mxu0 %v3381_v0  ;;  %3038 = vmatprep.subr.mxu1 %v3381_v0 }
 0x56e   :  { %3006 = vmatpush3.msra.mxu0 %v4186_v10  ;;  %3039 = vmatpush3.msra.mxu1 %v4294_v31 }
 0x56f   :  { %3007 = vmatprep.subr.mxu0 %v3381_v0  ;;  %3040 = vmatprep.subr.mxu1 %v3381_v0 }
 0x570   :  { %3008 = vmatpush3.msra.mxu0 %v4193_v11  ;;  %3041 = vmatpush3.msra.mxu1 %v4305_v33 }
 0x571   :  { %3009 = vmatprep.subr.mxu0 %v3381_v0  ;;  %3042 = vmatprep.subr.mxu1 %v3381_v0 }
 0x572   :  { %3010 = vmatpush3.msra.mxu0 %v4200_v12  ;;  %3043 = vmatpush3.msra.mxu1 %v4316_v35 }
 0x573   :  { %3011 = vmatprep.subr.mxu0 %v3381_v0  ;;  %3044 = vmatprep.subr.mxu1 %v3381_v0 }
 0x574   :  { %3012 = vmatpush3.msra.mxu0 %v4210_v14  ;;  %3045 = vmatpush3.msra.mxu1 %v4327_v37 }
 0x575   :  { %3013 = vmatprep.subr.mxu0 %v3381_v0  ;;  %3046 = vmatprep.subr.mxu1 %v3381_v0 }
 0x576   :  { %3014 = vmatpush3.msra.mxu0 %v4217_v17  ;;  %3047 = vmatpush3.msra.mxu1 %v4338_v39 }
 0x577   :  { %3015 = vmatprep.subr.mxu0 %v3381_v0  ;;  %3048 = vmatprep.subr.mxu1 %v3381_v0 }
 0x578   :  { %3016 = vmatpush3.msra.mxu0 %v4224_v19  ;;  %3049 = vmatpush3.msra.mxu1 %v4349_v41 }
 0x579   :  { %3017 = vmatprep.subr.mxu0 %v3381_v0  ;;  %3050 = vmatprep.subr.mxu1 %v3381_v0 }
 0x57a   :  { %3018 = vmatpush3.msra.mxu0 %v4231_v20  ;;  %3051 = vmatpush3.msra.mxu1 %v4360_v43 }
 0x57b   :  { %3019 = vmatprep.subr.mxu0 %v3381_v0  ;;  %3052 = vmatprep.subr.mxu1 %v3381_v0 }
 0x57c   :  { %3020 = vmatpush3.msra.mxu0 %v4238_v21  ;;  %3053 = vmatpush3.msra.mxu1 %v4371_v45 }
 0x57d   :  { %3021 = vmatprep.subr.mxu0 %v3381_v0  ;;  %3054 = vmatprep.subr.mxu1 %v3381_v0 }
 0x57e   :  { %3022 = vmatpush3.msra.mxu0 %v4245_v22  ;;  %3055 = vmatpush3.msra.mxu1 %v4382_v47 }
 0x57f   :  { %3023 = vmatprep.subr.mxu0 %v3381_v0  ;;  %3056 = vmatprep.subr.mxu1 %v3381_v0 }
 0x580   :  { %3024 = vmatpush3.msra.mxu0 %v4252_v23  ;;  %3057 = vmatpush3.msra.mxu1 %v4393_v63 }
 0x581   :  { %3025 = vmatprep.subr.mxu0 %v3381_v0  ;;  %3058 = vmatprep.subr.mxu1 %v3381_v0 }
 0x582   :  { %3026 = vmatpush3.msra.mxu0 %v4259_v24  ;;  %3059 = vmatpush3.msra.mxu1 %v4404_v50 }
 0x583   :  { %3027 = vmatprep.subr.mxu0 %v3381_v0  ;;  %3060 = vmatprep.subr.mxu1 %v3381_v0 }
 0x584   :  { %3028 = vmatpush3.msra.mxu0 %v4266_v25  ;;  %3061 = vmatpush3.msra.mxu1 %v4415_v52 }
 0x585   :  { %3029 = vmatprep.subr.mxu0 %v3381_v0  ;;  %3062 = vmatprep.subr.mxu1 %v3381_v0 }
 0x586   :  { %3030 = vmatpush3.msra.mxu0 %v4273_v27  ;;  %3063 = vmatpush3.msra.mxu1 %v4426_v54 }
 0x587   :  { %3031 = vmatprep.subr.mxu0 %v3381_v0  ;;  %3064 = vmatprep.subr.mxu1 %v3381_v0 }
 0x588   :  { %3032 = vmatpush3.msra.mxu0 %v4283_v29  ;;  %3065 = vmatpush3.msra.mxu1 %v4437_v56 }
 0x589   :  { %3034 = vmatmul.mubr.f32.vlgmr.msra.gmra.mxu0 %v4468_v16  ;;  %3066 = vmatprep.subr.mxu1 %v3381_v0 }
 0x58a   :  { %3071 = vmatprep.subr.mxu0 %v3381_v0  ;;  %3067 = vmatpush3.msra.mxu1 %v4448_v59 }
 0x58b   :  { %3072 = vmatpush3.msra.mxu0 %v4291_v30  ;;  %3068 = vmatprep.mubr.msk.f32.mxu1 %vm3382_vm0, %v3381_v0 }
 0x58c   :  { %3073 = vmatprep.subr.mxu0 %v3381_v0  ;;  %3106 = vmatprep.subr.mxu1 %v3381_v0 }
 0x58d   :  { %3074 = vmatpush3.msra.mxu0 %v4302_v32  ;;  %3103 = vmatprep.mubr.msk.f32.mxu0 %vm3382_vm0, %v3381_v0 }
 0x58e   :  { %3075 = vmatprep.subr.mxu0 %v3381_v0 }
 0x58f   :  { %3076 = vmatpush3.msra.mxu0 %v4313_v34 }
 0x590   :  { %3077 = vmatprep.subr.mxu0 %v3381_v0 }
 0x591   :  { %3078 = vmatpush3.msra.mxu0 %v4324_v36 }
 0x592   :  { %3079 = vmatprep.subr.mxu0 %v3381_v0 }
 0x593   :  { %3080 = vmatpush3.msra.mxu0 %v4335_v38 }
 0x594   :  { %3081 = vmatprep.subr.mxu0 %v3381_v0 }
 0x595   :  { %3082 = vmatpush3.msra.mxu0 %v4346_v40 }
 0x596   :  { %3083 = vmatprep.subr.mxu0 %v3381_v0 }
 0x597   :  { %3084 = vmatpush3.msra.mxu0 %v4357_v42 }
 0x598   :  { %3085 = vmatprep.subr.mxu0 %v3381_v0 }
 0x599   :  { %3086 = vmatpush3.msra.mxu0 %v4368_v44 }
 0x59a   :  { %3087 = vmatprep.subr.mxu0 %v3381_v0 }
 0x59b   :  { %3088 = vmatpush3.msra.mxu0 %v4379_v46 }
 0x59c   :  { %3089 = vmatprep.subr.mxu0 %v3381_v0 }
 0x59d   :  { %3090 = vmatpush3.msra.mxu0 %v4390_v48 }
 0x59e   :  { %3091 = vmatprep.subr.mxu0 %v3381_v0 }
 0x59f   :  { %3092 = vmatpush3.msra.mxu0 %v4401_v49 }
 0x5a0   :  { %3093 = vmatprep.subr.mxu0 %v3381_v0 }
 0x5a1   :  { %3094 = vmatpush3.msra.mxu0 %v4412_v51 }
 0x5a2   :  { %3095 = vmatprep.subr.mxu0 %v3381_v0 }
 0x5a3   :  { %3096 = vmatpush3.msra.mxu0 %v4423_v53 }
 0x5a4   :  { %3097 = vmatprep.subr.mxu0 %v3381_v0 }
 0x5a5   :  { %3098 = vmatpush3.msra.mxu0 %v4434_v55 }
 0x5a6   :  { %3099 = vmatprep.subr.mxu0 %v3381_v0 }
 0x5a7   :  { %3100 = vmatpush3.msra.mxu0 %v4445_v58 }
 0x5a8   :  { %3101 = vmatprep.subr.mxu0 %v3381_v0 }
 0x5a9   :  { %3102 = vmatpush3.msra.mxu0 %v4457_v60 }
 0x5aa   :  { %3141 = vmatprep.subr.mxu0 %v3381_v0 }
 0x629   :  { %v1328_v57 = vpop.f32.mrf.mxu0 }
 0x62a   :  { %v1398_v18 = vpop.f32.mrf.mxu1 }
 0x62b   :  { %v1399_v26 = vadd.f32 %v1398_v18, %v1328_v57  ;;  %v2965_v61 = vpop.f32.mrf.mxu0 }
 0x62c   :  { %v3000_v62 = vpop.f32.mrf.mxu1 }
 0x62d   :  { %v1402_v2 = vadd.f32 %v4577_v1, %v1399_v26 }
 0x62f   :  { %3274 = vtanh.f32 %v1402_v2 }
 0x63c   :  { %v3275_v3 = vpop.eup %3274 }
 0x63d   :  { %3069 = vmatmul.mubr.f32.vlgmr.msra.gmra.mxu1 %v3275_v3 }
 0x63e   :  { %3107 = vmatpush3.msra.mxu1 %v4170_v8  ;;  %3138 = vmatprep.mubr.msk.f32.mxu1 %vm3382_vm0, %v3381_v0  ;;  %v1943_v8 = vld [vmem:[%s4712_s0 + $0x30] sm:$0xff] }
 0x63f   :  { %3108 = vmatprep.subr.mxu1 %v3381_v0 }
 0x640   :  { %3109 = vmatpush3.msra.mxu1 %v4179_v9 }
 0x641   :  { %3110 = vmatprep.subr.mxu1 %v3381_v0 }
 0x642   :  { %3111 = vmatpush3.msra.mxu1 %v4186_v10 }
 0x643   :  { %3112 = vmatprep.subr.mxu1 %v3381_v0 }
 0x644   :  { %3113 = vmatpush3.msra.mxu1 %v4193_v11 }
 0x645   :  { %3114 = vmatprep.subr.mxu1 %v3381_v0 }
 0x646   :  { %3115 = vmatpush3.msra.mxu1 %v4200_v12 }
 0x647   :  { %3116 = vmatprep.subr.mxu1 %v3381_v0 }
 0x648   :  { %3117 = vmatpush3.msra.mxu1 %v4210_v14 }
 0x649   :  { %3118 = vmatprep.subr.mxu1 %v3381_v0  ;;  %v1472_v9 = vpop.f32.mrf.mxu0 }
 0x64a   :  { %v1476_v10 = vadd.f32 %v1943_v8, %v1472_v9  ;;  %3119 = vmatpush3.msra.mxu1 %v4217_v17 }
 0x64b   :  { %3120 = vmatprep.subr.mxu1 %v3381_v0  ;;  %v3035_v11 = vpop.f32.mrf.mxu0 }
 0x64c   :  { %3276 = vtanh.f32 %v1476_v10  ;;  %3121 = vmatpush3.msra.mxu1 %v4224_v19 }
 0x64d   :  { %3122 = vmatprep.subr.mxu1 %v3381_v0 }
 0x64e   :  { %3123 = vmatpush3.msra.mxu1 %v4231_v20 }
 0x64f   :  { %3124 = vmatprep.subr.mxu1 %v3381_v0 }
 0x650   :  { %3125 = vmatpush3.msra.mxu1 %v4238_v21  ;;  %v1944_v21 = vld [vmem:[%s4712_s0 + $0x38] sm:$0xff] }
 0x651   :  { %3126 = vmatprep.subr.mxu1 %v3381_v0 }
 0x652   :  { %3127 = vmatpush3.msra.mxu1 %v4245_v22 }
 0x653   :  { %3128 = vmatprep.subr.mxu1 %v3381_v0 }
 0x654   :  { %3129 = vmatpush3.msra.mxu1 %v4252_v23 }
 0x655   :  { %3130 = vmatprep.subr.mxu1 %v3381_v0 }
 0x656   :  { %3131 = vmatpush3.msra.mxu1 %v4259_v24 }
 0x657   :  { %3132 = vmatprep.subr.mxu1 %v3381_v0 }
 0x658   :  { %3133 = vmatpush3.msra.mxu1 %v4266_v25 }
 0x659   :  { %v3277_v12 = vpop.eup %3276  ;;  %3134 = vmatprep.subr.mxu1 %v3381_v0 }
 0x65a   :  { %3135 = vmatpush3.msra.mxu1 %v4273_v27  ;;  %3104 = vmatmul.mubr.f32.vlgmr.msra.gmra.mxu0 %v3277_v12 }
 0x65b   :  { %3136 = vmatprep.subr.mxu1 %v3381_v0  ;;  %3142 = vmatpush3.msra.mxu0 %v4277_v28  ;;  %v1852_v28 = vld [vmem:[#allocation4 + $0x78] sm:$0xff] }
 0x65c   :  { %3137 = vmatpush3.msra.mxu1 %v4283_v29  ;;  %3143 = vmatprep.subr.mxu0 %v3381_v0 }
 0x65d   :  { %3139 = vmatmul.mubr.f32.vlgmr.msra.gmra.mxu1 %v3277_v12  ;;  %3176 = vmatprep.subr.mxu1 %v3381_v0 }
 0x65e   :  { %3177 = vmatpush3.msra.mxu1 %v4291_v30  ;;  %3144 = vmatpush3.msra.mxu0 %v4294_v31  ;;  %v1851_v31 = vld [vmem:[#allocation4 + $0x70] sm:$0xff] }
 0x65f   :  { %3178 = vmatprep.subr.mxu1 %v3381_v0  ;;  %3145 = vmatprep.subr.mxu0 %v3381_v0 }
 0x660   :  { %3179 = vmatpush3.msra.mxu1 %v4302_v32  ;;  %3146 = vmatpush3.msra.mxu0 %v4305_v33  ;;  %v1850_v32 = vld [vmem:[#allocation4 + $0x68] sm:$0xff]  ;;  %v1849_v33 = vld [vmem:[#allocation4 + $0x60] sm:$0xff] }
 0x661   :  { %3180 = vmatprep.subr.mxu1 %v3381_v0  ;;  %3147 = vmatprep.subr.mxu0 %v3381_v0 }
 0x662   :  { %3181 = vmatpush3.msra.mxu1 %v4313_v34  ;;  %3148 = vmatpush3.msra.mxu0 %v4316_v35  ;;  %v1848_v34 = vld [vmem:[#allocation4 + $0x58] sm:$0xff]  ;;  %v1847_v35 = vld [vmem:[#allocation4 + $0x50] sm:$0xff] }
 0x663   :  { %3182 = vmatprep.subr.mxu1 %v3381_v0  ;;  %3149 = vmatprep.subr.mxu0 %v3381_v0 }
 0x664   :  { %3183 = vmatpush3.msra.mxu1 %v4324_v36  ;;  %3150 = vmatpush3.msra.mxu0 %v4327_v37  ;;  %v1846_v36 = vld [vmem:[#allocation4 + $0x48] sm:$0xff]  ;;  %v1845_v37 = vld [vmem:[#allocation4 + $0x40] sm:$0xff] }
 0x665   :  { %3184 = vmatprep.subr.mxu1 %v3381_v0  ;;  %3151 = vmatprep.subr.mxu0 %v3381_v0 }
 0x666   :  { %3185 = vmatpush3.msra.mxu1 %v4335_v38  ;;  %3152 = vmatpush3.msra.mxu0 %v4338_v39  ;;  %v1844_v38 = vld [vmem:[#allocation4 + $0x38] sm:$0xff]  ;;  %v1843_v39 = vld [vmem:[#allocation4 + $0x30] sm:$0xff] }
 0x667   :  { %3186 = vmatprep.subr.mxu1 %v3381_v0  ;;  %3153 = vmatprep.subr.mxu0 %v3381_v0 }
 0x668   :  { %3187 = vmatpush3.msra.mxu1 %v4346_v40  ;;  %3154 = vmatpush3.msra.mxu0 %v4349_v41  ;;  %v1842_v40 = vld [vmem:[#allocation4 + $0x28] sm:$0xff]  ;;  %v1841_v41 = vld [vmem:[#allocation4 + $0x20] sm:$0xff] }
 0x669   :  { %3188 = vmatprep.subr.mxu1 %v3381_v0  ;;  %3155 = vmatprep.subr.mxu0 %v3381_v0 }
 0x66a   :  { %3189 = vmatpush3.msra.mxu1 %v4357_v42  ;;  %3156 = vmatpush3.msra.mxu0 %v4360_v43  ;;  %v1840_v42 = vld [vmem:[#allocation4 + $0x18] sm:$0xff]  ;;  %v1839_v43 = vld [vmem:[#allocation4 + $0x10] sm:$0xff] }
 0x66b   :  { %3190 = vmatprep.subr.mxu1 %v3381_v0  ;;  %3157 = vmatprep.subr.mxu0 %v3381_v0 }
 0x66c   :  { %3191 = vmatpush3.msra.mxu1 %v4368_v44  ;;  %3158 = vmatpush3.msra.mxu0 %v4371_v45  ;;  %v1838_v44 = vld [vmem:[#allocation4 + $0x8] sm:$0xff]  ;;  %v1837_v45 = vld [vmem:[#allocation4] sm:$0xff] }
 0x66d   :  { %3192 = vmatprep.subr.mxu1 %v3381_v0  ;;  %3159 = vmatprep.subr.mxu0 %v3381_v0 }
 0x66e   :  { %3193 = vmatpush3.msra.mxu1 %v4379_v46  ;;  %3160 = vmatpush3.msra.mxu0 %v4382_v47 }
 0x66f   :  { %3194 = vmatprep.subr.mxu1 %v3381_v0  ;;  %3161 = vmatprep.subr.mxu0 %v3381_v0 }
 0x670   :  { %3195 = vmatpush3.msra.mxu1 %v4390_v48  ;;  %3162 = vmatpush3.msra.mxu0 %v4393_v63 }
 0x671   :  { %3196 = vmatprep.subr.mxu1 %v3381_v0  ;;  %3163 = vmatprep.subr.mxu0 %v3381_v0 }
 0x672   :  { %3197 = vmatpush3.msra.mxu1 %v4401_v49  ;;  %3164 = vmatpush3.msra.mxu0 %v4404_v50 }
 0x673   :  { %3198 = vmatprep.subr.mxu1 %v3381_v0  ;;  %3165 = vmatprep.subr.mxu0 %v3381_v0 }
 0x674   :  { %3199 = vmatpush3.msra.mxu1 %v4412_v51  ;;  %3166 = vmatpush3.msra.mxu0 %v4415_v52 }
 0x675   :  { %3200 = vmatprep.subr.mxu1 %v3381_v0  ;;  %3167 = vmatprep.subr.mxu0 %v3381_v0 }
 0x676   :  { %3201 = vmatpush3.msra.mxu1 %v4423_v53  ;;  %3168 = vmatpush3.msra.mxu0 %v4426_v54  ;;  %v1945_v53 = vld [vmem:[%s4718_s6] ss:$0 sm:$0xff] }
 0x677   :  { %3202 = vmatprep.subr.mxu1 %v3381_v0  ;;  %3169 = vmatprep.subr.mxu0 %v3381_v0 }
 0x678   :  { %3203 = vmatpush3.msra.mxu1 %v4434_v55  ;;  %3170 = vmatpush3.msra.mxu0 %v4437_v56 }
 0x679   :  { %3204 = vmatprep.subr.mxu1 %v3381_v0  ;;  %3171 = vmatprep.subr.mxu0 %v3381_v0 }
 0x67a   :  { %3205 = vmatpush3.msra.mxu1 %v4445_v58  ;;  %3172 = vmatpush3.msra.mxu0 %v4448_v59 }
 0x67b   :  { %3206 = vmatprep.subr.mxu1 %v3381_v0  ;;  %3173 = vmatprep.mubr.msk.f32.mxu0 %vm3382_vm0, %v3381_v0 }
 0x67c   :  { %3207 = vmatpush3.msra.mxu1 %v4457_v60  ;;  %3208 = vmatprep.mubr.msk.f32.mxu1 %vm3382_vm0, %v3381_v0 }
 0x67d   :  { %3211 = vmatprep.subr.mxu0 %v3381_v0 }
 0x6fd   :  { %v1544_v14 = vpop.f32.mrf.mxu1 }
 0x6ff   :  { %v3070_v17 = vpop.f32.mrf.mxu1 }
 0x71a   :  { %v1614_v19 = vpop.f32.mrf.mxu0 }
 0x71b   :  { %v1615_v20 = vadd.f32 %v1614_v19, %v1544_v14 }
 0x71c   :  { %v3105_v22 = vpop.f32.mrf.mxu0 }
 0x71d   :  { %v1618_v23 = vadd.f32 %v4577_v1, %v1615_v20  ;;  %v1688_v24 = vpop.f32.mrf.mxu1 }
 0x71e   :  { %v1692_v25 = vadd.f32 %v1944_v21, %v1688_v24 }
 0x71f   :  { %3278 = vtanh.f32 %v1618_v23  ;;  %v3140_v27 = vpop.f32.mrf.mxu1 }
 0x720   :  { %3280 = vtanh.f32 %v1692_v25 }
 0x72c   :  { %v3279_v29 = vpop.eup %3278 }
 0x72d   :  { %v3281_v30 = vpop.eup %3280  ;;  %3174 = vmatmul.mubr.f32.vlgmr.msra.gmra.mxu0 %v3279_v29 }
 0x72e   :  { %3209 = vmatmul.mubr.f32.vlgmr.msra.gmra.mxu1 %v3281_v30  ;;  %3212 = vmatpush3.msra.mxu0 %v1852_v28 }
 0x72f   :  { %3213 = vmatprep.subr.mxu0 %v3381_v0  ;;  %3243 = vmatprep.mubr.msk.f32.mxu0 %vm3382_vm0, %v3381_v0 }
 0x730   :  { %3214 = vmatpush3.msra.mxu0 %v1851_v31 }
 0x731   :  { %3215 = vmatprep.subr.mxu0 %v3381_v0 }
 0x732   :  { %3216 = vmatpush3.msra.mxu0 %v1850_v32 }
 0x733   :  { %3217 = vmatprep.subr.mxu0 %v3381_v0 }
 0x734   :  { %3218 = vmatpush3.msra.mxu0 %v1849_v33 }
 0x735   :  { %3219 = vmatprep.subr.mxu0 %v3381_v0 }
 0x736   :  { %3220 = vmatpush3.msra.mxu0 %v1848_v34 }
 0x737   :  { %3221 = vmatprep.subr.mxu0 %v3381_v0 }
 0x738   :  { %3222 = vmatpush3.msra.mxu0 %v1847_v35 }
 0x739   :  { %3223 = vmatprep.subr.mxu0 %v3381_v0 }
 0x73a   :  { %3224 = vmatpush3.msra.mxu0 %v1846_v36 }
 0x73b   :  { %3225 = vmatprep.subr.mxu0 %v3381_v0 }
 0x73c   :  { %3226 = vmatpush3.msra.mxu0 %v1845_v37 }
 0x73d   :  { %3227 = vmatprep.subr.mxu0 %v3381_v0 }
 0x73e   :  { %3228 = vmatpush3.msra.mxu0 %v1844_v38 }
 0x73f   :  { %3229 = vmatprep.subr.mxu0 %v3381_v0 }
 0x740   :  { %3230 = vmatpush3.msra.mxu0 %v1843_v39 }
 0x741   :  { %3231 = vmatprep.subr.mxu0 %v3381_v0 }
 0x742   :  { %3232 = vmatpush3.msra.mxu0 %v1842_v40 }
 0x743   :  { %3233 = vmatprep.subr.mxu0 %v3381_v0 }
 0x744   :  { %3234 = vmatpush3.msra.mxu0 %v1841_v41 }
 0x745   :  { %3235 = vmatprep.subr.mxu0 %v3381_v0 }
 0x746   :  { %3236 = vmatpush3.msra.mxu0 %v1840_v42 }
 0x747   :  { %3237 = vmatprep.subr.mxu0 %v3381_v0 }
 0x748   :  { %3238 = vmatpush3.msra.mxu0 %v1839_v43 }
 0x749   :  { %3239 = vmatprep.subr.mxu0 %v3381_v0 }
 0x74a   :  { %3240 = vmatpush3.msra.mxu0 %v1838_v44 }
 0x74b   :  { %3241 = vmatprep.subr.mxu0 %v3381_v0 }
 0x74c   :  { %3242 = vmatpush3.msra.mxu0 %v1837_v45 }
 0x7ed   :  { %v1760_v46 = vpop.f32.mrf.mxu0 }
 0x7ee   :  { %v1830_v47 = vpop.f32.mrf.mxu1 }
 0x7ef   :  { %v1831_v48 = vadd.f32 %v1830_v47, %v1760_v46  ;;  %v3175_v63 = vpop.f32.mrf.mxu0 }
 0x7f0   :  { %v3210_v49 = vpop.f32.mrf.mxu1 }
 0x7f1   :  { %v1834_v50 = vadd.f32 %v4577_v1, %v1831_v48 }
 0x7f3   :  { %3282 = vtanh.f32 %v1834_v50 }
 0x800   :  { %v3283_v51 = vpop.eup %3282 }
 0x801   :  { %v1836_v52 = vmax.f32 %v3283_v51, 0.0 }
 0x803   :  { %3244 = vmatmul.mubr.f32.vlgmr.msra.gmra.mxu0 %v1836_v52 }
 0x8c3   :  { %v1926_v54 = vpop.f32.mrf.mxu0 }
 0x8c4   :  { %v1927_v55 = vadd.f32 %v1945_v53, %v1926_v54 }
 0x8c5   :  { %v3245_v0 = vpop.f32.mrf.mxu0 }
 0x8c6   :  { %1930 = vst [vmem:[%s4719_s7] sm:$0xff] %v1927_v55 }
 0x8c7   :  { %1935 = vsyncpa [#allocation3], 1 }
 0x8c8   :  { %1936 = vsyncpa [#allocation5], 1 }

</bundles_post_ra>
